<compile_context>
chip_gen: v7x
topology: tpu7x:2x2x1
jax: 0.10.0
libtpu: 0.0.40
codegen_flags: <defaults>
</compile_context>

<pallas_src>
import functools

import jax
import jax.numpy as jnp
from jax.experimental import pallas as pl
from jax.experimental.pallas import tpu as pltpu


def _round_up(n, m):
    return ((n + m - 1) // m) * m


def _pick_batch_tile(B, block_b):
    """Batch tile: one grid step for B <= block_b, sublane-aligned, and a
    multiple of 256 once >= 256 to fill the MXU M dimension (v6e/v7x)."""
    tb = min(block_b, B)
    if tb >= 256:
        return _round_up(tb, 256)
    return _round_up(tb, 8)


def actor_kernel(x_ref, w1_ref, b1_ref, w2_ref, b2_ref, w3_ref, b3_ref, o_ref):
    # fc1 + ReLU  (bf16 MXU matmuls, f32 accumulation / biases)
    h1 = jnp.dot(x_ref[...], w1_ref[...], preferred_element_type=jnp.float32)
    h1 = jnp.maximum(h1 + b1_ref[...], 0.0)
    # fc2 + ReLU
    h2 = jnp.dot(h1.astype(jnp.bfloat16), w2_ref[...],
                 preferred_element_type=jnp.float32)
    h2 = jnp.maximum(h2 + b2_ref[...], 0.0)
    # fc3 + tanh
    h3 = jnp.dot(h2.astype(jnp.bfloat16), w3_ref[...],
                 preferred_element_type=jnp.float32)
    o_ref[...] = jnp.tanh(h3 + b3_ref[...]).astype(o_ref.dtype)


@functools.partial(jax.jit, static_argnames=("n_actions", "block_b"))
def actor_forward(x, params, *, n_actions, block_b=1024):
    """Single-actor forward.  x: [B, obs] float32 -> [B, n_actions] float32."""
    w1, b1, w2, b2, w3, b3 = (
        params["w1"], params["b1"], params["w2"],
        params["b2"], params["w3"], params["b3"],
    )
    B, obs = x.shape
    nap = w3.shape[-1]  # lane-padded action width

    x = x.astype(jnp.bfloat16)               # halve streamed input DMA
    tb = _pick_batch_tile(B, block_b)
    Bp = _round_up(B, tb)
    if Bp != B:
        x = jnp.pad(x, ((0, Bp - B), (0, 0)))

    grid = (Bp // tb,)                        # (1,) for B <= block_b

    def resident(a):  # weights/biases: constant block index -> VMEM-resident
        return pl.BlockSpec(a.shape, lambda i: (0, 0))

    out = pl.pallas_call(
        actor_kernel,
        out_shape=jax.ShapeDtypeStruct((Bp, nap), jnp.float32),
        grid=grid,
        in_specs=[
            pl.BlockSpec((tb, obs), lambda i: (i, 0)),  # x: tiled over batch
            resident(w1), resident(b1),
            resident(w2), resident(b2),
            resident(w3), resident(b3),
        ],
        out_specs=pl.BlockSpec((tb, nap), lambda i: (i, 0)),
        compiler_params=pltpu.CompilerParams(
            dimension_semantics=("arbitrary",)),
    )(x, w1, b1, w2, b2, w3, b3)

    return out[:B, :n_actions]


@functools.partial(jax.jit, static_argnames=("n_actions", "block_b"))
def maddpg_actors_forward(x, params, *, n_actions, block_b=1024):
    """All MADDPG actors in one pallas_call.

    x: [A, B, obs] float32; params: agent-stacked padded weights/biases
    (leading dim A).  Returns [A, B, n_actions] float32.  Amortizes kernel
    launch and weight HBM reads across agents; batch iterates innermost so
    each agent's weights are DMA'd exactly once.
    """
    w1, b1, w2, b2, w3, b3 = (
        params["w1"], params["b1"], params["w2"],
        params["b2"], params["w3"], params["b3"],
    )
    A, B, obs = x.shape
    nap = w3.shape[-1]

    x = x.astype(jnp.bfloat16)
    tb = _pick_batch_tile(B, block_b)
    Bp = _round_up(B, tb)
    if Bp != B:
        x = jnp.pad(x, ((0, 0), (0, Bp - B), (0, 0)))

    grid = (A, Bp // tb)  # agent-major: batch tiles inner, weights stay put

    def per_agent(a):  # select this agent's slab; agent dim squeezed away
        block = (None,) + a.shape[1:]
        return pl.BlockSpec(block, lambda ai, bi: (ai,) + (0,) * (a.ndim - 1))

    out = pl.pallas_call(
        actor_kernel,
        out_shape=jax.ShapeDtypeStruct((A, Bp, nap), jnp.float32),
        grid=grid,
        in_specs=[
            pl.BlockSpec((None, tb, obs), lambda ai, bi: (ai, bi, 0)),
            per_agent(w1), per_agent(b1),
            per_agent(w2), per_agent(b2),
            per_agent(w3), per_agent(b3),
        ],
        out_specs=pl.BlockSpec((None, tb, nap), lambda ai, bi: (ai, bi, 0)),
        # On v7x, switching the agent axis to pltpu.CORE_PARALLEL engages both
        # TensorCores once per-agent work is large; kept "parallel" here.
        compiler_params=pltpu.CompilerParams(
            dimension_semantics=("parallel", "arbitrary")),
    )(x, w1, b1, w2, b2, w3, b3)

    return out[:, :B, :n_actions]


def init_actor_params(key, obs_size, n_actions, hidden1=400, hidden2=300,
                      weight_dtype=jnp.bfloat16):
    """nn.Linear default init U(-1/sqrt(fan_in), +1/sqrt(fan_in)), then
    zero-padded to lane-aligned widths.  Weights bf16, biases f32."""
    ks = jax.random.split(key, 6)
    h1p = _round_up(hidden1, 128)    # 400 -> 512
    h2p = _round_up(hidden2, 128)    # 300 -> 384
    nap = _round_up(n_actions, 128)  # 8   -> 128

    def linear(kw, kb, fan_in, fan_out, fan_in_pad, fan_out_pad):
        bound = 1.0 / jnp.sqrt(jnp.float32(fan_in))
        w = jax.random.uniform(kw, (fan_in, fan_out), jnp.float32, -bound, bound)
        b = jax.random.uniform(kb, (1, fan_out), jnp.float32, -bound, bound)
        w = jnp.pad(w, ((0, fan_in_pad - fan_in), (0, fan_out_pad - fan_out)))
        b = jnp.pad(b, ((0, 0), (0, fan_out_pad - fan_out)))
        return w.astype(weight_dtype), b

    w1, b1 = linear(ks[0], ks[1], obs_size, hidden1, obs_size, h1p)
    w2, b2 = linear(ks[2], ks[3], hidden1, hidden2, h1p, h2p)
    w3, b3 = linear(ks[4], ks[5], hidden2, n_actions, h2p, nap)
    return {"w1": w1, "b1": b1, "w2": w2, "b2": b2, "w3": w3, "b3": b3}


def actor_reference(x, p, n_actions):
    """XLA reference using the same padded bf16 weights / f32 accumulation."""
    h1 = jnp.dot(x.astype(jnp.bfloat16), p["w1"],
                 preferred_element_type=jnp.float32) + p["b1"]
    h1 = jnp.maximum(h1, 0.0)
    h2 = jnp.dot(h1.astype(jnp.bfloat16), p["w2"],
                 preferred_element_type=jnp.float32) + p["b2"]
    h2 = jnp.maximum(h2, 0.0)
    h3 = jnp.dot(h2.astype(jnp.bfloat16), p["w3"],
                 preferred_element_type=jnp.float32) + p["b3"]
    return jnp.tanh(h3)[:, :n_actions]


if __name__ == "__main__":
    key = jax.random.PRNGKey(0)
    k_x, k_p = jax.random.split(key)

    batch = 256          # single grid step: tb = 256 (MXU-filling M on v6e/v7x)
    obs_size = 32
    n_actions = 8
    hidden1, hidden2 = 400, 300  # module defaults (padded internally)

    # ---- single actor (matches the PyTorch module forward) ----
    x = jax.random.normal(k_x, (batch, obs_size), jnp.float32)
    params = init_actor_params(k_p, obs_size, n_actions, hidden1, hidden2)

    out = actor_forward(x, params, n_actions=n_actions)
    out = jax.block_until_ready(out)

    ref = actor_reference(x, params, n_actions)
    assert out.shape == (batch, n_actions)
    assert jnp.allclose(out, ref, atol=2e-3, rtol=2e-3), float(
        jnp.max(jnp.abs(out - ref)))

    # ---- all MADDPG actors in one pallas_call (agent-stacked) ----
    n_agents = 3
    agent_param_keys = jax.random.split(k_p, n_agents)
    agent_params = [init_actor_params(k, obs_size, n_actions, hidden1, hidden2)
                    for k in agent_param_keys]
    stacked_params = jax.tree_util.tree_map(
        lambda *leaves: jnp.stack(leaves, axis=0), *agent_params)
    agent_x_keys = jax.random.split(k_x, n_agents)
    xs = jnp.stack([jax.random.normal(k, (batch, obs_size), jnp.float32)
                    for k in agent_x_keys], axis=0)

    out_all = maddpg_actors_forward(xs, stacked_params, n_actions=n_actions)
    out_all = jax.block_until_ready(out_all)
    assert out_all.shape == (n_agents, batch, n_actions)
    for a in range(n_agents):
        ref_a = actor_reference(xs[a], agent_params[a], n_actions)
        assert jnp.allclose(out_all[a], ref_a, atol=2e-3, rtol=2e-3), float(
            jnp.max(jnp.abs(out_all[a] - ref_a)))

    print("KERNEL_OK")
</pallas_src>

<mosaic_0001>
module attributes {stable_mosaic.version = 11 : i64} {
  func.func @actor_kernel(%arg0: i32, %arg1: memref<256x32xbf16, #tpu.memory_space<vmem>>, %arg2: memref<32x512xbf16, #tpu.memory_space<vmem>>, %arg3: memref<1x512xf32, #tpu.memory_space<vmem>>, %arg4: memref<512x384xbf16, #tpu.memory_space<vmem>>, %arg5: memref<1x384xf32, #tpu.memory_space<vmem>>, %arg6: memref<384x128xbf16, #tpu.memory_space<vmem>>, %arg7: memref<1x128xf32, #tpu.memory_space<vmem>>, %arg8: memref<256x128xf32, #tpu.memory_space<vmem>>) attributes {dimension_semantics = [#tpu.dimension_semantics<arbitrary>], iteration_bounds = array<i64: 1>, scalar_prefetch = 0 : i64, scratch_operands = 0 : i64, tpu.core_type = #tpu.core_type<tc>, window_params = [{transform_indices = @transform_0, window_bounds = array<i64: 256, 32>}, {pipeline_mode = #tpu.pipeline_mode<synchronous>, transform_indices = @transform_1, window_bounds = array<i64: 32, 512>}, {pipeline_mode = #tpu.pipeline_mode<synchronous>, transform_indices = @transform_2, window_bounds = array<i64: 1, 512>}, {pipeline_mode = #tpu.pipeline_mode<synchronous>, transform_indices = @transform_3, window_bounds = array<i64: 512, 384>}, {pipeline_mode = #tpu.pipeline_mode<synchronous>, transform_indices = @transform_4, window_bounds = array<i64: 1, 384>}, {pipeline_mode = #tpu.pipeline_mode<synchronous>, transform_indices = @transform_5, window_bounds = array<i64: 384, 128>}, {pipeline_mode = #tpu.pipeline_mode<synchronous>, transform_indices = @transform_6, window_bounds = array<i64: 1, 128>}, {transform_indices = @transform_7, window_bounds = array<i64: 256, 128>}]} {
    %c0 = arith.constant 0 : index
    %c0_0 = arith.constant 0 : index
    %0 = vector.load %arg1[%c0, %c0_0] : memref<256x32xbf16, #tpu.memory_space<vmem>>, vector<256x32xbf16>
    %c0_1 = arith.constant 0 : index
    %c0_2 = arith.constant 0 : index
    %1 = vector.load %arg2[%c0_1, %c0_2] : memref<32x512xbf16, #tpu.memory_space<vmem>>, vector<32x512xbf16>
    %cst = arith.constant dense<0.000000e+00> : vector<256x512xf32>
    %2 = tpu.matmul %0, %1, %cst {dimension_numbers = #tpu.dot_dimension_numbers<[1], [0], [0], [1], [0, 0, 1, 1], [], []>} : vector<256x32xbf16>, vector<32x512xbf16>, vector<256x512xf32> -> vector<256x512xf32>
    %c0_3 = arith.constant 0 : index
    %c0_4 = arith.constant 0 : index
    %3 = vector.load %arg3[%c0_3, %c0_4] : memref<1x512xf32, #tpu.memory_space<vmem>>, vector<1x512xf32>
    %4 = vector.broadcast %3 : vector<1x512xf32> to vector<256x512xf32>
    %5 = arith.addf %2, %4 : vector<256x512xf32>
    %cst_5 = arith.constant 0.000000e+00 : f32
    %6 = vector.broadcast %cst_5 : f32 to vector<256x512xf32>
    %7 = arith.maximumf %5, %6 : vector<256x512xf32>
    %8 = arith.truncf %7 : vector<256x512xf32> to vector<256x512xbf16>
    %c0_6 = arith.constant 0 : index
    %c0_7 = arith.constant 0 : index
    %9 = vector.load %arg4[%c0_6, %c0_7] : memref<512x384xbf16, #tpu.memory_space<vmem>>, vector<512x384xbf16>
    %cst_8 = arith.constant dense<0.000000e+00> : vector<256x384xf32>
    %10 = tpu.matmul %8, %9, %cst_8 {dimension_numbers = #tpu.dot_dimension_numbers<[1], [0], [0], [1], [0, 0, 1, 1], [], []>} : vector<256x512xbf16>, vector<512x384xbf16>, vector<256x384xf32> -> vector<256x384xf32>
    %c0_9 = arith.constant 0 : index
    %c0_10 = arith.constant 0 : index
    %11 = vector.load %arg5[%c0_9, %c0_10] : memref<1x384xf32, #tpu.memory_space<vmem>>, vector<1x384xf32>
    %12 = vector.broadcast %11 : vector<1x384xf32> to vector<256x384xf32>
    %13 = arith.addf %10, %12 : vector<256x384xf32>
    %cst_11 = arith.constant 0.000000e+00 : f32
    %14 = vector.broadcast %cst_11 : f32 to vector<256x384xf32>
    %15 = arith.maximumf %13, %14 : vector<256x384xf32>
    %16 = arith.truncf %15 : vector<256x384xf32> to vector<256x384xbf16>
    %c0_12 = arith.constant 0 : index
    %c0_13 = arith.constant 0 : index
    %17 = vector.load %arg6[%c0_12, %c0_13] : memref<384x128xbf16, #tpu.memory_space<vmem>>, vector<384x128xbf16>
    %cst_14 = arith.constant dense<0.000000e+00> : vector<256x128xf32>
    %18 = tpu.matmul %16, %17, %cst_14 {dimension_numbers = #tpu.dot_dimension_numbers<[1], [0], [0], [1], [0, 0, 1, 1], [], []>} : vector<256x384xbf16>, vector<384x128xbf16>, vector<256x128xf32> -> vector<256x128xf32>
    %c0_15 = arith.constant 0 : index
    %c0_16 = arith.constant 0 : index
    %19 = vector.load %arg7[%c0_15, %c0_16] : memref<1x128xf32, #tpu.memory_space<vmem>>, vector<1x128xf32>
    %20 = vector.broadcast %19 : vector<1x128xf32> to vector<256x128xf32>
    %21 = arith.addf %18, %20 : vector<256x128xf32>
    %22 = math.tanh %21 : vector<256x128xf32>
    %c0_17 = arith.constant 0 : index
    %c0_18 = arith.constant 0 : index
    %23 = vector.load %arg8[%c0_17, %c0_18] : memref<256x128xf32, #tpu.memory_space<vmem>>, vector<256x128xf32>
    tpu.vector_store %arg8[%c0_17, %c0_18], %22 {strides = array<i32>} : memref<256x128xf32, #tpu.memory_space<vmem>>, vector<256x128xf32>,
    return
  }
  func.func @transform_0(%arg0: i32) -> (i32, i32) {
    %c0_i32 = arith.constant 0 : i32
    %c0_i32_0 = arith.constant 0 : i32
    return %arg0, %c0_i32 : i32, i32
  }
  func.func @transform_1(%arg0: i32) -> (i32, i32) {
    %c0_i32 = arith.constant 0 : i32
    %c0_i32_0 = arith.constant 0 : i32
    %c0_i32_1 = arith.constant 0 : i32
    return %c0_i32, %c0_i32_0 : i32, i32
  }
  func.func @transform_2(%arg0: i32) -> (i32, i32) {
    %c0_i32 = arith.constant 0 : i32
    %c0_i32_0 = arith.constant 0 : i32
    %c0_i32_1 = arith.constant 0 : i32
    return %c0_i32, %c0_i32_0 : i32, i32
  }
  func.func @transform_3(%arg0: i32) -> (i32, i32) {
    %c0_i32 = arith.constant 0 : i32
    %c0_i32_0 = arith.constant 0 : i32
    %c0_i32_1 = arith.constant 0 : i32
    return %c0_i32, %c0_i32_0 : i32, i32
  }
  func.func @transform_4(%arg0: i32) -> (i32, i32) {
    %c0_i32 = arith.constant 0 : i32
    %c0_i32_0 = arith.constant 0 : i32
    %c0_i32_1 = arith.constant 0 : i32
    return %c0_i32, %c0_i32_0 : i32, i32
  }
  func.func @transform_5(%arg0: i32) -> (i32, i32) {
    %c0_i32 = arith.constant 0 : i32
    %c0_i32_0 = arith.constant 0 : i32
    %c0_i32_1 = arith.constant 0 : i32
    return %c0_i32, %c0_i32_0 : i32, i32
  }
  func.func @transform_6(%arg0: i32) -> (i32, i32) {
    %c0_i32 = arith.constant 0 : i32
    %c0_i32_0 = arith.constant 0 : i32
    %c0_i32_1 = arith.constant 0 : i32
    return %c0_i32, %c0_i32_0 : i32, i32
  }
  func.func @transform_7(%arg0: i32) -> (i32, i32) {
    %c0_i32 = arith.constant 0 : i32
    %c0_i32_0 = arith.constant 0 : i32
    return %arg0, %c0_i32 : i32, i32
  }
}

</mosaic_0001>

<bundles_post_ra>
// kernel: actor_forward.1
= control target key start
LH: loop header
LB: loop body
LE: loop exit
PB: predicated region body
PF: predicated region fallthrough
CT: control target
= control target key end

     0   :  { %12 = vsyncpa [#allocation3], 0  ;;  %s3938_s24 = smov [#allocation2]   ;;  %s4903_s0 = inlined_call_operand.vmem [shape: bf16[256,32], index: 0, kind: input, shape index: {}]   ;;  %s4904_s1 = inlined_call_operand.vmem [shape: bf16[32,512], index: 1, kind: input, shape index: {}]   ;;  %s4905_s2 = inlined_call_operand.vmem [shape: f32[1,512], index: 2, kind: input, shape index: {}]   ;;  %s4906_s3 = inlined_call_operand.hbm [shape: bf16[512,384], index: 3, kind: input, shape index: {}]   ;;  %s4907_s4 = inlined_call_operand.vmem [shape: f32[1,384], index: 4, kind: input, shape index: {}]   ;;  %s4908_s5 = inlined_call_operand.vmem [shape: bf16[384,128], index: 5, kind: input, shape index: {}]   ;;  %s4909_s6 = inlined_call_operand.vmem [shape: f32[1,128], index: 6, kind: input, shape index: {}]   ;;  %s4910_s7 = inlined_call_operand.vmem [shape: f32[256,128], index: 7, kind: output, shape index: {}]  }
   0x1   :  { %s24_s25 = sshll.u32 %s3938_s24, 4  ;;  %s3914_s28 = scalar_lea.hbm %s4906_s3, 12288  ;;  %s25_s25 = int_to_ptr.vmem [resolvable:$true] %s24_s25 }
   0x2   :  { %p3915_p0 = scmp.ne.s32.totalorder %s4906_s3, %s3914_s28  ;;  %p3918_p1 = scmp.lt.u32.totalorder %s3914_s28, %s4906_s3 }
   0x4   :  { %p3920_p2 = pnand %p3918_p1, %p3915_p0 }
   0x6   :  { %3923 = shalt.err (!%p3920_p2)
}
   0x7   :  { %s3924_s10 = scalar_lea.vmem %s25_s25, 12288  ;;  %p3929_p4 = scmp.lt.s32.totalorder %s25_s25, %s25_s25 }
   0x8   :  { %p3925_p3 = scmp.ne.s32.totalorder %s25_s25, %s3924_s10  ;;  %p3930_p5 = scmp.lt.s32.totalorder %s3924_s10, %s3924_s10 }
   0xa   :  { %p3931_p6 = por %p3930_p5, %p3929_p4 }
   0xc   :  { %p3932_p7 = pnand %p3931_p6, %p3925_p3 }
   0xe   :  { %3935 = shalt.err (!%p3932_p7)
}
   0xf   :  { %s3939_s11 = smov 192   ;;  %s3940_s12 = smov 12  }
  0x10   :  { %30 = dma.hbm_to_vmem [thread:$0]  %s4906_s3, 12288, %s25_s25, [#allocation3], %s3939_s11, %s3939_s11, %s3940_s12  }
  0x11   :  { %3936 = dma.done.wait [#allocation3], 12288  }
  0x12   :  { %3937 = vsyncadd [#allocation3], 4294955008  ;;  %v3941_v0 = vmov 0   ;;  %v3670_v1 = vld [vmem:[%s4904_s1 + $0x4] ss:$16 sps:$4 sm:$0xff]   ;;  %vm223_vm0 = vcmask 261120  }
  0x13   :  { %304 = vmatprep.mubr.bf16.mxu0 %v3941_v0  ;;  %424 = vmatprep.mubr.bf16.mxu1 %v3941_v0  ;;  %v3672_v2 = vld [vmem:[%s4904_s1] ss:$16 sps:$4 sm:$0xff]   ;;  %v3673_v3 = vld [vmem:[%s4904_s1 + $0x24] ss:$16 sps:$4 sm:$0xff]   ;;  %v3686_v7 = vld [vmem:[%s4904_s1 + $0x8] ss:$16 sps:$4 sm:$0xff]  }
  0x14   :  { %272 = vmatprep.subr.bf16.mxu0 %v3670_v1  ;;  %3534 = vmatprep.subr.bf16.mxu1 %v3670_v1  ;;  %v3675_v4 = vld [vmem:[%s4904_s1 + $0x20] ss:$16 sps:$4 sm:$0xff]   ;;  %v3688_v8 = vld [vmem:[%s4904_s1 + $0xc] ss:$16 sps:$4 sm:$0xff]   ;;  %v3693_v11 = vld [vmem:[%s4904_s1 + $0x28] ss:$16 sps:$4 sm:$0xff]  }
  0x15   :  { %273 = vmatpush1.bf16.msra.mxu0 %v3672_v2  ;;  %3536 = vmatpush1.bf16.msra.mxu1 %v3672_v2  ;;  %v3676_v5 = vld [vmem:[%s4903_s0] sm:$0xff]   ;;  %v4029_v9 = vld [vmem:[%s4903_s0 + $0x8] sm:$0xff]   ;;  %v4049_v13 = vld [vmem:[%s4903_s0 + $0x10] sm:$0xff]  }
  0x16   :  { %274 = vmatprep.subr.bf16.mxu0 %v3673_v3  ;;  %3535 = vmatprep.subr.bf16.mxu1 %v3673_v3  ;;  %v4016_v6 = vld [vmem:[%s4903_s0 + $0x60] sm:$0xff]   ;;  %v4035_v10 = vld [vmem:[%s4903_s0 + $0x68] sm:$0xff]   ;;  %v4057_v15 = vld [vmem:[%s4903_s0 + $0x70] sm:$0xff]  }
  0x17   :  { %v3695_v12 = vld [vmem:[%s4904_s1 + $0x2c] ss:$16 sps:$4 sm:$0xff]   ;;  %v3698_v14 = vld [vmem:[#allocation2 + $0xc8] ss:$12 sps:$4 sm:$0xff]   ;;  %v3704_v17 = vld [vmem:[#allocation2 + $0x4] ss:$12 sps:$4 sm:$0xff]  }
  0x18   :  { %v3702_v16 = vld [vmem:[#allocation2] ss:$12 sps:$4 sm:$0xff]   ;;  %v3707_v18 = vld [vmem:[#allocation2 + $0x18] ss:$12 sps:$4 sm:$0xff]   ;;  %v3709_v19 = vld [vmem:[#allocation2 + $0x1c] ss:$12 sps:$4 sm:$0xff]  }
  0x19   :  { %275 = vmatpush1.bf16.msra.mxu0 %v3675_v4  ;;  %3537 = vmatpush1.bf16.msra.mxu1 %v3675_v4  ;;  %v4067_v20 = vld [vmem:[%s4903_s0 + $0x18] sm:$0xff]   ;;  %v3712_v21 = vld [vmem:[#allocation2 + $0x34] ss:$12 sps:$4 sm:$0xff]   ;;  %v3720_v27 = vld [vmem:[#allocation2 + $0x64] ss:$12 sps:$4 sm:$0xff]  }
  0x1a   :  { %465 = vmatprep.subr.bf16.mxu1 %v3688_v8  ;;  %1507 = vmatprep.subr.bf16.mxu0 %v3704_v17  ;;  %v4073_v22 = vld [vmem:[%s4903_s0 + $0x78] sm:$0xff]   ;;  %v4081_v25 = vld [vmem:[%s4903_s0 + $0x20] sm:$0xff]   ;;  %v3713_v26 = vld [vmem:[#allocation2 + $0x48] ss:$12 sps:$4 sm:$0xff]  }
  0x1b   :  { %v3710_v23 = vld [vmem:[#allocation2 + $0x30] ss:$12 sps:$4 sm:$0xff]   ;;  %v3715_v24 = vld [vmem:[#allocation2 + $0x4c] ss:$12 sps:$4 sm:$0xff]   ;;  %v3699_v28 = vld [vmem:[#allocation2 + $0x8] ss:$12 sps:$4 sm:$0xff]  }
  0x1c   :  { %2973 = vmatmul.mubr.msk.bf16.vlgmr.msra.gmra.mrb[0].mxu0 %vm223_vm0, %v3676_v5  ;;  %2985 = vmatmul.mubr.msk.bf16.vlgmr.msra.gmra.mrb[0].mxu1 %vm223_vm0, %v4016_v6  ;;  %v3718_v29 = vld [vmem:[#allocation2 + $0x60] ss:$12 sps:$4 sm:$0xff]   ;;  %v3723_v31 = vld [vmem:[#allocation2 + $0x7c] ss:$12 sps:$4 sm:$0xff]   ;;  %v3721_v32 = vld [vmem:[#allocation2 + $0x78] ss:$12 sps:$4 sm:$0xff]  }
  0x1d   :  { %314 = vmatprep.mubr.bf16.mxu0 %v3941_v0  ;;  %434 = vmatprep.mubr.bf16.mxu1 %v3941_v0  ;;  %v3700_v30 = vld [vmem:[#allocation2 + $0xe0] ss:$12 sps:$4 sm:$0xff]   ;;  %v3705_v35 = vld [vmem:[#allocation2 + $0xf8] ss:$12 sps:$4 sm:$0xff]   ;;  %v3725_v38 = vld [vmem:[#allocation2 + $0x90] ss:$12 sps:$4 sm:$0xff]  }
  0x1e   :  { %466 = vmatpush1.bf16.msra.mxu1 %v3686_v7  ;;  %1508 = vmatpush1.bf16.msra.mxu0 %v3702_v16  ;;  %v4093_v33 = vld [vmem:[%s4903_s0 + $0x28] sm:$0xff]   ;;  %v3706_v36 = vld [vmem:[#allocation2 + $0x38] ss:$12 sps:$4 sm:$0xff]   ;;  %v3727_v37 = vld [vmem:[#allocation2 + $0x94] ss:$12 sps:$4 sm:$0xff]  }
  0x1f   :  { %467 = vmatprep.subr.bf16.mxu1 %v3695_v12  ;;  %1509 = vmatprep.subr.bf16.mxu0 %v3709_v19  ;;  %v3701_v34 = vld [vmem:[#allocation2 + $0x20] ss:$12 sps:$4 sm:$0xff]   ;;  %v3716_v39 = vld [vmem:[#allocation2 + $0x110] ss:$12 sps:$4 sm:$0xff]   ;;  %v3729_v43 = vld [vmem:[#allocation2 + $0xa8] ss:$12 sps:$4 sm:$0xff]  }
  0x20   :  { %v3731_v40 = vld [vmem:[#allocation2 + $0xac] ss:$12 sps:$4 sm:$0xff]   ;;  %v4102_v41 = vld [vmem:[%s4903_s0 + $0x30] sm:$0xff]   ;;  %v3739_v49 = vld [vmem:[#allocation2 + $0xdc] ss:$12 sps:$4 sm:$0xff]  }
  0x21   :  { %v3717_v42 = vld [vmem:[#allocation2 + $0x50] ss:$12 sps:$4 sm:$0xff]   ;;  %v3724_v44 = vld [vmem:[#allocation2 + $0x128] ss:$12 sps:$4 sm:$0xff]   ;;  %v3732_v45 = vld [vmem:[#allocation2 + $0xc0] ss:$12 sps:$4 sm:$0xff]  }
  0x22   :  { %468 = vmatpush1.bf16.msra.mxu1 %v3693_v11  ;;  %1510 = vmatpush1.bf16.msra.mxu0 %v3707_v18  ;;  %v3728_v46 = vld [vmem:[#allocation2 + $0x68] ss:$12 sps:$4 sm:$0xff]   ;;  %v3734_v47 = vld [vmem:[#allocation2 + $0xc4] ss:$12 sps:$4 sm:$0xff]   ;;  %v3735_v48 = vld [vmem:[#allocation2 + $0x140] ss:$12 sps:$4 sm:$0xff]  }
  0x23   :  { %3126 = vmatprep.subr.bf16.mxu1 %v3698_v14  ;;  %1511 = vmatprep.subr.bf16.mxu0 %v3712_v21  ;;  %v3737_v50 = vld [vmem:[#allocation2 + $0xd8] ss:$12 sps:$4 sm:$0xff]   ;;  %v3736_v52 = vld [vmem:[#allocation2 + $0x80] ss:$12 sps:$4 sm:$0xff]   ;;  %v3740_v55 = vld [vmem:[#allocation2 + $0xf0] ss:$12 sps:$4 sm:$0xff]   ;;  %v83_v14 = vlaneseq }
  0x24   :  { %2974 = vmatmul.mubr.msk.bf16.gmra.mrb[4].mxu0 %vm223_vm0, %v4029_v9  ;;  %2986 = vmatmul.mubr.msk.bf16.gmra.mrb[4].mxu1 %vm223_vm0, %v4035_v10  ;;  %v4113_v51 = vld [vmem:[%s4903_s0 + $0x38] sm:$0xff]   ;;  %v3742_v53 = vld [vmem:[#allocation2 + $0xf4] ss:$12 sps:$4 sm:$0xff]   ;;  %v3750_v61 = vld [vmem:[#allocation2 + $0x124] ss:$12 sps:$4 sm:$0xff]  }
  0x25   :  { %324 = vmatprep.mubr.bf16.mxu0 %v3941_v0  ;;  %444 = vmatprep.mubr.bf16.mxu1 %v3941_v0  ;;  %v3746_v54 = vld [vmem:[#allocation2 + $0x158] ss:$12 sps:$4 sm:$0xff]   ;;  %v3754_v58 = vld [vmem:[#allocation2 + $0x170] ss:$12 sps:$4 sm:$0xff]   ;;  %v3743_v59 = vld [vmem:[#allocation2 + $0x108] ss:$12 sps:$4 sm:$0xff]  }
  0x26   :  { %1512 = vmatpush1.bf16.msra.mxu0 %v3710_v23  ;;  %v3745_v56 = vld [vmem:[#allocation2 + $0x10c] ss:$12 sps:$4 sm:$0xff]   ;;  %v3685_v60 = vld [vmem:[%s4903_s0 + $0x40] sm:$0xff]   ;;  %v3758_v62 = vld [vmem:[#allocation2 + $0xb0] ss:$12 sps:$4 sm:$0xff]   ;;  %v4174_v16 = vshrl.u32 %v83_v14, 7 }
  0x27   :  { %1513 = vmatprep.subr.bf16.mxu0 %v3715_v24  ;;  %v3747_v57 = vld [vmem:[#allocation2 + $0x98] ss:$12 sps:$4 sm:$0xff]   ;;  %v3748_v63 = vld [vmem:[#allocation2 + $0x120] ss:$12 sps:$4 sm:$0xff]   ;;  %v3753_v1 = vld [vmem:[#allocation2 + $0x13c] ss:$12 sps:$4 sm:$0xff]  }
  0x28   :  { %v3751_v2 = vld [vmem:[#allocation2 + $0x138] ss:$12 sps:$4 sm:$0xff]   ;;  %v3690_v3 = vld [vmem:[%s4903_s0 + $0x48] sm:$0xff]   ;;  %v3757_v4 = vld [vmem:[#allocation2 + $0x154] ss:$12 sps:$4 sm:$0xff]  }
  0x29   :  { %v3692_v7 = vld [vmem:[%s4903_s0 + $0x50] sm:$0xff]   ;;  %v3697_v8 = vld [vmem:[%s4903_s0 + $0x58] sm:$0xff]   ;;  %v4180_v17 = vld [vmem:[%s4905_s2] sm:$0xf] }
  0x2a   :  { %1514 = vmatpush1.bf16.msra.mxu0 %v3713_v26  ;;  %v3759_v11 = vld [vmem:[#allocation2 + $0x168] ss:$12 sps:$4 sm:$0xff]   ;;  %v3764_v12 = vld [vmem:[#allocation2 + $0x184] ss:$12 sps:$4 sm:$0xff]  }
  0x2b   :  { %1515 = vmatprep.subr.bf16.mxu0 %v3720_v27 }
  0x2c   :  { %2975 = vmatmul.mubr.msk.bf16.gmra.mrb[8].mxu0 %vm223_vm0, %v4049_v13  ;;  %2987 = vmatmul.mubr.msk.bf16.gmra.mrb[8].mxu1 %vm223_vm0, %v4057_v15 }
  0x2d   :  { %334 = vmatprep.mubr.bf16.mxu0 %v3941_v0  ;;  %454 = vmatprep.mubr.bf16.mxu1 %v3941_v0 }
  0x2e   :  { %1516 = vmatpush1.bf16.msra.mxu0 %v3718_v29 }
  0x2f   :  { %1517 = vmatprep.subr.bf16.mxu0 %v3723_v31 }
  0x32   :  { %1518 = vmatpush1.bf16.msra.mxu0 %v3721_v32 }
  0x33   :  { %1519 = vmatprep.subr.bf16.mxu0 %v3727_v37 }
  0x34   :  { %2976 = vmatmul.mubr.msk.bf16.gmra.mrb[12].mxu0 %vm223_vm0, %v4067_v20  ;;  %2988 = vmatmul.mubr.msk.bf16.gmra.mrb[12].mxu1 %vm223_vm0, %v4073_v22 }
  0x35   :  { %344 = vmatprep.mubr.bf16.mxu0 %v3941_v0  ;;  %497 = vmatprep.mubr.bf16.mxu1 %v3941_v0 }
  0x36   :  { %1520 = vmatpush1.bf16.msra.mxu0 %v3725_v38 }
  0x37   :  { %1521 = vmatprep.subr.bf16.mxu0 %v3731_v40 }
  0x3a   :  { %1522 = vmatpush1.bf16.msra.mxu0 %v3729_v43  ;;  %v3762_v43 = vld [vmem:[#allocation2 + $0x180] ss:$12 sps:$4 sm:$0xff]  }
  0x3b   :  { %1523 = vmatprep.subr.bf16.mxu0 %v3734_v47 }
  0x3c   :  { %2977 = vmatmul.mubr.msk.bf16.gmra.mrb[16].mxu0 %vm223_vm0, %v4081_v25  ;;  %2989 = vmatmul.mubr.msk.bf16.vlgmr.msra.gmra.mrb[16].mxu1 %vm223_vm0, %v3676_v5  ;;  %v3755_v5 = vld [vmem:[#allocation2 + $0x150] ss:$12 sps:$4 sm:$0xff]  }
  0x3d   :  { %354 = vmatprep.mubr.bf16.mxu0 %v3941_v0  ;;  %3127 = vmatpush3.bf16.msra.mxu1 %v3699_v28 }
  0x3e   :  { %507 = vmatprep.mubr.bf16.mxu1 %v3941_v0  ;;  %3128 = vmatprep.subr.bf16.mxu1 %v3700_v30 }
  0x3f   :  { %1524 = vmatpush1.bf16.msra.mxu0 %v3732_v45 }
  0x40   :  { %1525 = vmatprep.subr.bf16.mxu0 %v3739_v49  ;;  %v3773_v49 = vld [vmem:[#allocation2 + $0x260] ss:$12 sps:$4 sm:$0xff]  }
  0x41   :  { %3129 = vmatpush3.bf16.msra.mxu1 %v3701_v34 }
  0x42   :  { %3130 = vmatprep.subr.bf16.mxu1 %v3705_v35 }
  0x43   :  { %1526 = vmatpush1.bf16.msra.mxu0 %v3737_v50 }
  0x44   :  { %2978 = vmatmul.mubr.msk.bf16.gmra.mrb[20].mxu0 %vm223_vm0, %v4093_v33  ;;  %2990 = vmatmul.mubr.msk.bf16.gmra.mrb[20].mxu1 %vm223_vm0, %v4029_v9  ;;  %v3761_v9 = vld [vmem:[#allocation2 + $0x16c] ss:$12 sps:$4 sm:$0xff]  }
  0x45   :  { %364 = vmatprep.mubr.bf16.mxu0 %v3941_v0  ;;  %517 = vmatprep.mubr.bf16.mxu1 %v3941_v0 }
  0x46   :  { %3131 = vmatpush3.bf16.msra.mxu1 %v3706_v36  ;;  %1527 = vmatprep.subr.bf16.mxu0 %v3742_v53 }
  0x47   :  { %3132 = vmatprep.subr.bf16.mxu1 %v3716_v39  ;;  %1528 = vmatpush1.bf16.msra.mxu0 %v3740_v55 }
  0x48   :  { %1529 = vmatprep.subr.bf16.mxu0 %v3745_v56  ;;  %v3767_v56 = vld [vmem:[#allocation2 + $0x198] ss:$12 sps:$4 sm:$0xff]  }
  0x4a   :  { %3133 = vmatpush3.bf16.msra.mxu1 %v3717_v42 }
  0x4b   :  { %3134 = vmatprep.subr.bf16.mxu1 %v3724_v44  ;;  %1530 = vmatpush1.bf16.msra.mxu0 %v3743_v59  ;;  %v3766_v44 = vld [vmem:[#allocation2 + $0x188] ss:$12 sps:$4 sm:$0xff]  }
  0x4c   :  { %2979 = vmatmul.mubr.msk.bf16.gmra.mrb[24].mxu0 %vm223_vm0, %v4102_v41  ;;  %2991 = vmatmul.mubr.msk.bf16.gmra.mrb[24].mxu1 %vm223_vm0, %v4049_v13  ;;  %v3765_v13 = vld [vmem:[#allocation2 + $0x248] ss:$12 sps:$4 sm:$0xff]  }
  0x4d   :  { %374 = vmatprep.mubr.bf16.mxu0 %v3941_v0  ;;  %527 = vmatprep.mubr.bf16.mxu1 %v3941_v0 }
  0x4e   :  { %3135 = vmatpush3.bf16.msra.mxu1 %v3728_v46  ;;  %1531 = vmatprep.subr.bf16.mxu0 %v3750_v61  ;;  %v3774_v61 = vld [vmem:[#allocation2 + $0x1a0] ss:$12 sps:$4 sm:$0xff]  }
  0x4f   :  { %3136 = vmatprep.subr.bf16.mxu1 %v3735_v48  ;;  %1532 = vmatpush1.bf16.msra.mxu0 %v3748_v63  ;;  %v3769_v48 = vld [vmem:[#allocation2 + $0x19c] ss:$12 sps:$4 sm:$0xff]  }
  0x50   :  { %1533 = vmatprep.subr.bf16.mxu0 %v3753_v1 }
  0x52   :  { %3137 = vmatpush3.bf16.msra.mxu1 %v3736_v52 }
  0x53   :  { %3138 = vmatprep.subr.bf16.mxu1 %v3746_v54  ;;  %1534 = vmatpush1.bf16.msra.mxu0 %v3751_v2 }
  0x54   :  { %2980 = vmatmul.mubr.msk.bf16.gmra.mrb[28].mxu0 %vm223_vm0, %v4113_v51  ;;  %2992 = vmatmul.mubr.msk.bf16.gmra.mrb[28].mxu1 %vm223_vm0, %v4067_v20 }
  0x55   :  { %384 = vmatprep.mubr.bf16.mxu0 %v3941_v0  ;;  %537 = vmatprep.mubr.bf16.mxu1 %v3941_v0 }
  0x56   :  { %3139 = vmatpush3.bf16.msra.mxu1 %v3747_v57  ;;  %1535 = vmatprep.subr.bf16.mxu0 %v3757_v4 }
  0x57   :  { %3140 = vmatprep.subr.bf16.mxu1 %v3754_v58  ;;  %1536 = vmatpush1.bf16.msra.mxu0 %v3755_v5 }
  0x58   :  { %1537 = vmatprep.subr.bf16.mxu0 %v3761_v9 }
  0x5a   :  { %3141 = vmatpush3.bf16.msra.mxu1 %v3758_v62 }
  0x5b   :  { %1538 = vmatpush1.bf16.msra.mxu0 %v3759_v11  ;;  %3238 = vmatprep.subr.bf16.mxu1 %v3765_v13 }
  0x5c   :  { %2981 = vmatmul.mubr.msk.bf16.gmra.mrb[32].mxu0 %vm223_vm0, %v3685_v60  ;;  %2993 = vmatmul.mubr.msk.bf16.gmra.mrb[32].mxu1 %vm223_vm0, %v4081_v25 }
  0x5d   :  { %394 = vmatprep.mubr.bf16.mxu0 %v3941_v0  ;;  %547 = vmatprep.mubr.bf16.mxu1 %v3941_v0 }
  0x5e   :  { %1700 = vmatprep.subr.bf16.mxu0 %v3764_v12 }
  0x64   :  { %2982 = vmatmul.mubr.msk.bf16.gmra.mrb[36].mxu0 %vm223_vm0, %v3690_v3  ;;  %2994 = vmatmul.mubr.msk.bf16.gmra.mrb[36].mxu1 %vm223_vm0, %v4093_v33 }
  0x65   :  { %404 = vmatprep.mubr.bf16.mxu0 %v3941_v0  ;;  %557 = vmatprep.mubr.bf16.mxu1 %v3941_v0 }
  0x6c   :  { %2983 = vmatmul.mubr.msk.bf16.gmra.mrb[40].mxu0 %vm223_vm0, %v3692_v7  ;;  %2995 = vmatmul.mubr.msk.bf16.gmra.mrb[40].mxu1 %vm223_vm0, %v4102_v41 }
  0x6d   :  { %414 = vmatprep.mubr.bf16.mxu0 %v3941_v0  ;;  %567 = vmatprep.mubr.bf16.mxu1 %v3941_v0 }
  0x74   :  { %2984 = vmatmul.mubr.msk.bf16.gmra.mrb[44].mxu0 %vm223_vm0, %v3697_v8  ;;  %2996 = vmatmul.mubr.msk.bf16.gmra.mrb[44].mxu1 %vm223_vm0, %v4113_v51 }
  0x75   :  { %577 = vmatprep.mubr.bf16.mxu1 %v3941_v0 }
  0x7c   :  { %2997 = vmatmul.mubr.msk.bf16.gmra.mrb[48].mxu1 %vm223_vm0, %v3685_v60  ;;  %v3772_v60 = vld [vmem:[#allocation2 + $0x1b4] ss:$12 sps:$4 sm:$0xff]  }
  0x7d   :  { %587 = vmatprep.mubr.bf16.mxu1 %v3941_v0 }
  0x84   :  { %2998 = vmatmul.mubr.msk.bf16.gmra.mrb[52].mxu1 %vm223_vm0, %v3690_v3  ;;  %v3781_v3 = vld [vmem:[#allocation2 + $0x278] ss:$12 sps:$4 sm:$0xff]  }
  0x85   :  { %597 = vmatprep.mubr.bf16.mxu1 %v3941_v0 }
  0x8c   :  { %2999 = vmatmul.mubr.msk.bf16.gmra.mrb[56].mxu1 %vm223_vm0, %v3692_v7 }
  0x8d   :  { %607 = vmatprep.mubr.bf16.mxu1 %v3941_v0 }
  0x94   :  { %3000 = vmatmul.mubr.msk.bf16.gmra.mrb[60].mxu1 %vm223_vm0, %v3697_v8 }
  0x95   :  { %617 = vmatprep.mubr.bf16.mxu1 %v3941_v0 }
  0x9c   :  { %3001 = vmatmul.mubr.msk.bf16.gmra.mrb[64].mxu1 %vm223_vm0, %v4016_v6  ;;  %v85_v6 = vsub.s32 0, %v4174_v16 }
  0x9d   :  { %627 = vmatprep.mubr.bf16.mxu1 %v3941_v0 }
  0xa4   :  { %3002 = vmatmul.mubr.msk.bf16.gmra.mrb[68].mxu1 %vm223_vm0, %v4035_v10  ;;  %v89_v10 = vsub.s32 1, %v4174_v16 }
  0xa5   :  { %637 = vmatprep.mubr.bf16.mxu1 %v3941_v0 }
  0xac   :  { %3003 = vmatmul.mubr.msk.bf16.gmra.mrb[72].mxu1 %vm223_vm0, %v4057_v15  ;;  %v4186_v15 = vrot.slane %v4180_v17, %v85_v6 }
  0xad   :  { %647 = vmatprep.mubr.bf16.mxu1 %v3941_v0  ;;  %v4191_v0 = vrot.slane %v4180_v17, %v89_v10 }
  0xb4   :  { %3004 = vmatmul.mubr.msk.bf16.gmra.mrb[76].mxu1 %vm223_vm0, %v4073_v22 }
  0xef   :  { %v306_v18 = vpop.f32.mrb[0].mxu0  ;;  %v426_v25 = vpop.f32.mrb[0].mxu1 }
  0xf0   :  { %v307_v19 = vadd.f32 %v306_v18, %v4186_v15  ;;  %v308_v20 = vpop.f32.mrb[1].mxu0  ;;  %v427_v27 = vadd.f32 %v426_v25, %v4186_v15  ;;  %v428_v28 = vpop.f32.mrb[1].mxu1 }
  0xf1   :  { %v309_v21 = vadd.f32 %v308_v20, %v4191_v0  ;;  %v310_v22 = vpop.f32.mrb[2].mxu0  ;;  %v429_v31 = vadd.f32 %v428_v28, %v4191_v0  ;;  %v430_v32 = vpop.f32.mrb[2].mxu1 }
  0xf2   :  { %v311_v23 = vadd.f32 %v310_v22, %v4186_v15  ;;  %v312_v24 = vpop.f32.mrb[3].mxu0  ;;  %v658_v29 = vmax.f32 %v307_v19, 0.0  ;;  %v754_v35 = vmax.f32 %v427_v27, 0.0  ;;  %v431_v36 = vadd.f32 %v430_v32, %v4186_v15  ;;  %v432_v37 = vpop.f32.mrb[3].mxu1  ;;  %v3782_v22 = vld [vmem:[#allocation2 + $0x1b8] ss:$12 sps:$4 sm:$0xff]  }
  0xf3   :  { %v313_v26 = vadd.f32 %v312_v24, %v4191_v0  ;;  %v659_v33 = vmax.f32 %v309_v21, 0.0  ;;  %v755_v39 = vmax.f32 %v429_v31, 0.0  ;;  %v433_v40 = vadd.f32 %v432_v37, %v4191_v0  ;;  %v3770_v21 = vld [vmem:[#allocation2 + $0x1b0] ss:$12 sps:$4 sm:$0xff]  }
  0xf4   :  { %v662_v30 = vmax.f32 %v311_v23, 0.0  ;;  %v758_v45 = vmax.f32 %v431_v36, 0.0  ;;  %v3789_v27 = vld [vmem:[#allocation2 + $0x290] ss:$12 sps:$4 sm:$0xff]  }
  0xf5   :  { %v663_v34 = vmax.f32 %v313_v26, 0.0  ;;  %v759_v50 = vmax.f32 %v433_v40, 0.0  ;;  %v3777_v26 = vld [vmem:[#allocation2 + $0x1cc] ss:$12 sps:$4 sm:$0xff]  }
  0xf6   :  { %v786_v38 = vpack.c.bf16 %v662_v30, %v658_v29  ;;  %v4203_v53 = vpack.c.bf16 %v758_v45, %v754_v35 }
  0xf7   :  { %v787_v41 = vpack.c.bf16 %v663_v34, %v659_v33  ;;  %v316_v42 = vpop.f32.mrb[4].mxu0  ;;  %v4206_v57 = vpack.c.bf16 %v759_v50, %v755_v39  ;;  %v436_v58 = vpop.f32.mrb[4].mxu1  ;;  %v3775_v34 = vld [vmem:[#allocation2 + $0x1c8] ss:$12 sps:$4 sm:$0xff]   ;;  %v3790_v39 = vld [vmem:[#allocation2 + $0x1d0] ss:$12 sps:$4 sm:$0xff]  }
  0xf8   :  { %v317_v46 = vadd.f32 %v316_v42, %v4186_v15  ;;  %v318_v47 = vpop.f32.mrb[5].mxu0  ;;  %v437_v62 = vadd.f32 %v436_v58, %v4186_v15  ;;  %v438_v63 = vpop.f32.mrb[5].mxu1 }
  0xf9   :  { %v319_v51 = vadd.f32 %v318_v47, %v4191_v0  ;;  %v320_v52 = vpop.f32.mrb[6].mxu0  ;;  %1539 = vmatprep.mubr.bf16.mxu0 %v787_v41  ;;  %1925 = vmatprep.mubr.bf16.mxu1 %v787_v41  ;;  %v439_v4 = vadd.f32 %v438_v63, %v4191_v0  ;;  %v440_v5 = vpop.f32.mrb[6].mxu1 }
  0xfa   :  { %v321_v54 = vadd.f32 %v320_v52, %v4186_v15  ;;  %v322_v55 = vpop.f32.mrb[7].mxu0  ;;  %1540 = vmatmul.mubr.bf16.vlgmr.msra.gmra.mrb[48].mxu0 %v786_v38  ;;  %1926 = vmatmul.mubr.bf16.vlgmr.msra.gmra.mrb[80].mxu1 %v786_v38  ;;  %v666_v1 = vmax.f32 %v317_v46, 0.0  ;;  %v762_v9 = vmax.f32 %v437_v62, 0.0  ;;  %v441_v11 = vadd.f32 %v440_v5, %v4186_v15  ;;  %v442_v12 = vpop.f32.mrb[7].mxu1  ;;  %v3780_v38 = vld [vmem:[#allocation2 + $0x1e4] ss:$12 sps:$4 sm:$0xff]  }
  0xfb   :  { %v323_v59 = vadd.f32 %v322_v55, %v4191_v0  ;;  %1701 = vmatpush1.bf16.msra.mxu0 %v3762_v43  ;;  %3239 = vmatpush3.bf16.msra.mxu1 %v3766_v44  ;;  %v667_v7 = vmax.f32 %v319_v51, 0.0  ;;  %v763_v14 = vmax.f32 %v439_v4, 0.0  ;;  %v443_v18 = vadd.f32 %v442_v12, %v4191_v0  ;;  %v3797_v44 = vld [vmem:[#allocation2 + $0x2a8] ss:$12 sps:$4 sm:$0xff]  }
  0xfc   :  { %v670_v2 = vmax.f32 %v321_v54, 0.0  ;;  %1702 = vmatprep.subr.bf16.mxu0 %v3769_v48  ;;  %3240 = vmatprep.subr.bf16.mxu1 %v3773_v49  ;;  %v766_v23 = vmax.f32 %v441_v11, 0.0  ;;  %v3783_v11 = vld [vmem:[#allocation2 + $0x1f8] ss:$12 sps:$4 sm:$0xff]  }
  0xfd   :  { %v671_v8 = vmax.f32 %v323_v59, 0.0  ;;  %v767_v28 = vmax.f32 %v443_v18, 0.0  ;;  %v3778_v59 = vld [vmem:[#allocation2 + $0x1e0] ss:$12 sps:$4 sm:$0xff]  }
  0xfe   :  { %v790_v13 = vpack.c.bf16 %v670_v2, %v666_v1  ;;  %v4215_v31 = vpack.c.bf16 %v766_v23, %v762_v9  ;;  %v3785_v1 = vld [vmem:[#allocation2 + $0x1fc] ss:$12 sps:$4 sm:$0xff]   ;;  %v3788_v18 = vld [vmem:[#allocation2 + $0x214] ss:$12 sps:$4 sm:$0xff]  }
  0xff   :  { %v791_v19 = vpack.c.bf16 %v671_v8, %v667_v7  ;;  %v326_v20 = vpop.f32.mrb[8].mxu0  ;;  %1703 = vmatpush1.bf16.msra.mxu0 %v3767_v56  ;;  %3241 = vmatpush3.bf16.msra.mxu1 %v3774_v61  ;;  %v4218_v35 = vpack.c.bf16 %v767_v28, %v763_v14  ;;  %v446_v36 = vpop.f32.mrb[8].mxu1  ;;  %v3813_v28 = vld [vmem:[#allocation2 + $0x2d8] ss:$12 sps:$4 sm:$0xff]  }
 0x100   :  { %v327_v24 = vadd.f32 %v326_v20, %v4186_v15  ;;  %v328_v25 = vpop.f32.mrb[9].mxu0  ;;  %1704 = vmatprep.subr.bf16.mxu0 %v3772_v60  ;;  %3242 = vmatprep.subr.bf16.mxu1 %v3781_v3  ;;  %v447_v40 = vadd.f32 %v446_v36, %v4186_v15  ;;  %v448_v41 = vpop.f32.mrb[9].mxu1  ;;  %v3798_v60 = vld [vmem:[#allocation2 + $0x1e8] ss:$12 sps:$4 sm:$0xff]   ;;  %v3805_v3 = vld [vmem:[#allocation2 + $0x2c0] ss:$12 sps:$4 sm:$0xff]  }
 0x101   :  { %v329_v29 = vadd.f32 %v328_v25, %v4191_v0  ;;  %v330_v30 = vpop.f32.mrb[10].mxu0  ;;  %1549 = vmatprep.mubr.bf16.mxu0 %v791_v19  ;;  %1933 = vmatprep.mubr.bf16.mxu1 %v791_v19  ;;  %v449_v45 = vadd.f32 %v448_v41, %v4191_v0  ;;  %v450_v46 = vpop.f32.mrb[10].mxu1  ;;  %v3786_v41 = vld [vmem:[#allocation2 + $0x210] ss:$12 sps:$4 sm:$0xff]  }
 0x102   :  { %v331_v32 = vadd.f32 %v330_v30, %v4186_v15  ;;  %v332_v33 = vpop.f32.mrb[11].mxu0  ;;  %1550 = vmatmul.mubr.bf16.gmra.mrb[52].mxu0 %v790_v13  ;;  %1934 = vmatmul.mubr.bf16.gmra.mrb[84].mxu1 %v790_v13  ;;  %v674_v42 = vmax.f32 %v327_v24, 0.0  ;;  %v770_v49 = vmax.f32 %v447_v40, 0.0  ;;  %v451_v50 = vadd.f32 %v450_v46, %v4186_v15  ;;  %v452_v51 = vpop.f32.mrb[11].mxu1 }
 0x103   :  { %v333_v37 = vadd.f32 %v332_v33, %v4191_v0  ;;  %1705 = vmatpush1.bf16.msra.mxu0 %v3770_v21  ;;  %3243 = vmatpush3.bf16.msra.mxu1 %v3782_v22  ;;  %v675_v47 = vmax.f32 %v329_v29, 0.0  ;;  %v771_v54 = vmax.f32 %v449_v45, 0.0  ;;  %v453_v55 = vadd.f32 %v452_v51, %v4191_v0  ;;  %v3806_v22 = vld [vmem:[#allocation2 + $0x200] ss:$12 sps:$4 sm:$0xff]  }
 0x104   :  { %v678_v43 = vmax.f32 %v331_v32, 0.0  ;;  %1706 = vmatprep.subr.bf16.mxu0 %v3777_v26  ;;  %3244 = vmatprep.subr.bf16.mxu1 %v3789_v27  ;;  %v774_v61 = vmax.f32 %v451_v50, 0.0  ;;  %v93_v21 = vsub.s32 2, %v4174_v16  ;;  %v97_v27 = vsub.s32 3, %v4174_v16  ;;  %v3821_v50 = vld [vmem:[#allocation2 + $0x2f0] ss:$12 sps:$4 sm:$0xff]  }
 0x105   :  { %v679_v48 = vmax.f32 %v333_v37, 0.0  ;;  %v775_v2 = vmax.f32 %v453_v55, 0.0 }
 0x106   :  { %v794_v52 = vpack.c.bf16 %v678_v43, %v674_v42  ;;  %v4227_v7 = vpack.c.bf16 %v774_v61, %v770_v49  ;;  %v4242_v43 = vrot.slane %v4180_v17, %v93_v21  ;;  %v4246_v49 = vrot.slane %v4180_v17, %v97_v27 }
 0x107   :  { %v795_v56 = vpack.c.bf16 %v679_v48, %v675_v47  ;;  %v336_v58 = vpop.f32.mrb[12].mxu0  ;;  %1707 = vmatpush1.bf16.msra.mxu0 %v3775_v34  ;;  %3245 = vmatpush3.bf16.msra.mxu1 %v3790_v39  ;;  %v4230_v12 = vpack.c.bf16 %v775_v2, %v771_v54  ;;  %v456_v13 = vpop.f32.mrb[12].mxu1  ;;  %v3793_v47 = vld [vmem:[#allocation2 + $0x22c] ss:$12 sps:$4 sm:$0xff]  }
 0x108   :  { %v337_v62 = vadd.f32 %v336_v58, %v4186_v15  ;;  %v338_v63 = vpop.f32.mrb[13].mxu0  ;;  %1708 = vmatprep.subr.bf16.mxu0 %v3780_v38  ;;  %3246 = vmatprep.subr.bf16.mxu1 %v3797_v44  ;;  %v457_v19 = vadd.f32 %v456_v13, %v4186_v15  ;;  %v458_v20 = vpop.f32.mrb[13].mxu1  ;;  %v3814_v44 = vld [vmem:[#allocation2 + $0x218] ss:$12 sps:$4 sm:$0xff]  }
 0x109   :  { %v339_v4 = vadd.f32 %v338_v63, %v4191_v0  ;;  %v340_v5 = vpop.f32.mrb[14].mxu0  ;;  %1559 = vmatprep.mubr.bf16.mxu0 %v795_v56  ;;  %1941 = vmatprep.mubr.bf16.mxu1 %v795_v56  ;;  %v459_v25 = vadd.f32 %v458_v20, %v4191_v0  ;;  %v460_v26 = vpop.f32.mrb[14].mxu1  ;;  %v3822_v63 = vld [vmem:[#allocation2 + $0x230] ss:$12 sps:$4 sm:$0xff]  }
 0x10a   :  { %v341_v8 = vadd.f32 %v340_v5, %v4186_v15  ;;  %v342_v9 = vpop.f32.mrb[15].mxu0  ;;  %1560 = vmatmul.mubr.bf16.gmra.mrb[56].mxu0 %v794_v52  ;;  %1942 = vmatmul.mubr.bf16.gmra.mrb[88].mxu1 %v794_v52  ;;  %v682_v23 = vmax.f32 %v337_v62, 0.0  ;;  %v778_v32 = vmax.f32 %v457_v19, 0.0  ;;  %v461_v33 = vadd.f32 %v460_v26, %v4186_v15  ;;  %v462_v34 = vpop.f32.mrb[15].mxu1 }
 0x10b   :  { %v343_v14 = vadd.f32 %v342_v9, %v4191_v0  ;;  %1709 = vmatpush1.bf16.msra.mxu0 %v3778_v59  ;;  %3247 = vmatpush3.bf16.msra.mxu1 %v3798_v60  ;;  %v683_v29 = vmax.f32 %v339_v4, 0.0  ;;  %v779_v37 = vmax.f32 %v459_v25, 0.0  ;;  %v463_v38 = vadd.f32 %v462_v34, %v4191_v0  ;;  %v3791_v60 = vld [vmem:[#allocation2 + $0x228] ss:$12 sps:$4 sm:$0xff]  }
 0x10c   :  { %v686_v24 = vmax.f32 %v341_v8, 0.0  ;;  %1710 = vmatprep.subr.bf16.mxu0 %v3785_v1  ;;  %3248 = vmatprep.subr.bf16.mxu1 %v3805_v3  ;;  %v782_v42 = vmax.f32 %v461_v33, 0.0  ;;  %v3796_v3 = vld [vmem:[#allocation2 + $0x244] ss:$12 sps:$4 sm:$0xff]  }
 0x10d   :  { %v687_v30 = vmax.f32 %v343_v14, 0.0  ;;  %v783_v48 = vmax.f32 %v463_v38, 0.0 }
 0x10e   :  { %v798_v36 = vpack.c.bf16 %v686_v24, %v682_v23  ;;  %v4249_v54 = vpack.c.bf16 %v782_v42, %v778_v32  ;;  %v3794_v24 = vld [vmem:[#allocation2 + $0x240] ss:$12 sps:$4 sm:$0xff]  }
 0x10f   :  { %v799_v39 = vpack.c.bf16 %v687_v30, %v683_v29  ;;  %v346_v40 = vpop.f32.mrb[16].mxu0  ;;  %1711 = vmatpush1.bf16.msra.mxu0 %v3783_v11  ;;  %3249 = vmatpush3.bf16.msra.mxu1 %v3806_v22  ;;  %v4252_v58 = vpack.c.bf16 %v783_v48, %v779_v37  ;;  %v499_v59 = vpop.f32.mrb[16].mxu1 }
 0x110   :  { %v347_v45 = vadd.f32 %v346_v40, %v4186_v15  ;;  %v348_v46 = vpop.f32.mrb[17].mxu0  ;;  %1712 = vmatprep.subr.bf16.mxu0 %v3788_v18  ;;  %3250 = vmatprep.subr.bf16.mxu1 %v3813_v28  ;;  %v500_v61 = vadd.f32 %v499_v59, %v4242_v43  ;;  %v501_v62 = vpop.f32.mrb[17].mxu1  ;;  %v3801_v28 = vld [vmem:[#allocation2 + $0x25c] ss:$12 sps:$4 sm:$0xff]   ;;  %v3799_v40 = vld [vmem:[#allocation2 + $0x258] ss:$12 sps:$4 sm:$0xff]  }
 0x111   :  { %v349_v51 = vadd.f32 %v348_v46, %v4191_v0  ;;  %v350_v52 = vpop.f32.mrb[18].mxu0  ;;  %1569 = vmatprep.mubr.bf16.mxu0 %v799_v39  ;;  %1949 = vmatprep.mubr.bf16.mxu1 %v799_v39  ;;  %v502_v4 = vadd.f32 %v501_v62, %v4246_v49  ;;  %v503_v5 = vpop.f32.mrb[18].mxu1  ;;  %v3804_v46 = vld [vmem:[#allocation2 + $0x274] ss:$12 sps:$4 sm:$0xff]  }
 0x112   :  { %v351_v55 = vadd.f32 %v350_v52, %v4186_v15  ;;  %v352_v56 = vpop.f32.mrb[19].mxu0  ;;  %1570 = vmatmul.mubr.bf16.gmra.mrb[60].mxu0 %v798_v36  ;;  %1950 = vmatmul.mubr.bf16.gmra.mrb[92].mxu1 %v798_v36  ;;  %v690_v1 = vmax.f32 %v347_v45, 0.0  ;;  %v660_v11 = vmax.f32 %v500_v61, 0.0  ;;  %v504_v13 = vadd.f32 %v503_v5, %v4242_v43  ;;  %v505_v14 = vpop.f32.mrb[19].mxu1 }
 0x113   :  { %v353_v17 = vadd.f32 %v352_v56, %v4191_v0  ;;  %1713 = vmatpush1.bf16.msra.mxu0 %v3786_v41  ;;  %3251 = vmatpush3.bf16.msra.mxu1 %v3814_v44  ;;  %v691_v8 = vmax.f32 %v349_v51, 0.0  ;;  %v661_v19 = vmax.f32 %v502_v4, 0.0  ;;  %v506_v20 = vadd.f32 %v505_v14, %v4246_v49  ;;  %v3809_v4 = vld [vmem:[#allocation2 + $0x28c] ss:$12 sps:$4 sm:$0xff]  }
 0x114   :  { %v694_v2 = vmax.f32 %v351_v55, 0.0  ;;  %1714 = vmatprep.subr.bf16.mxu0 %v3793_v47  ;;  %3252 = vmatprep.subr.bf16.mxu1 %v3821_v50  ;;  %v664_v25 = vmax.f32 %v504_v13, 0.0 }
 0x115   :  { %v695_v9 = vmax.f32 %v353_v17, 0.0  ;;  %v665_v29 = vmax.f32 %v506_v20, 0.0 }
 0x116   :  { %v802_v18 = vpack.c.bf16 %v694_v2, %v690_v1  ;;  %v4261_v33 = vpack.c.bf16 %v664_v25, %v660_v11 }
 0x117   :  { %v803_v22 = vpack.c.bf16 %v695_v9, %v691_v8  ;;  %v356_v23 = vpop.f32.mrb[20].mxu0  ;;  %1715 = vmatpush1.bf16.msra.mxu0 %v3791_v60  ;;  %3253 = vmatpush3.bf16.msra.mxu1 %v3822_v63  ;;  %v4264_v37 = vpack.c.bf16 %v665_v29, %v661_v19  ;;  %v509_v38 = vpop.f32.mrb[20].mxu1  ;;  %v3802_v63 = vld [vmem:[#allocation2 + $0x270] ss:$12 sps:$4 sm:$0xff]  }
 0x118   :  { %v357_v26 = vadd.f32 %v356_v23, %v4186_v15  ;;  %v358_v27 = vpop.f32.mrb[21].mxu0  ;;  %1716 = vmatprep.subr.bf16.mxu0 %v3796_v3  ;;  %v510_v41 = vadd.f32 %v509_v38, %v4242_v43  ;;  %v511_v42 = vpop.f32.mrb[21].mxu1 }
 0x119   :  { %v359_v30 = vadd.f32 %v358_v27, %v4191_v0  ;;  %v360_v32 = vpop.f32.mrb[22].mxu0  ;;  %1579 = vmatprep.mubr.bf16.mxu0 %v803_v22  ;;  %1957 = vmatprep.mubr.bf16.mxu1 %v803_v22  ;;  %v512_v47 = vadd.f32 %v511_v42, %v4246_v49  ;;  %v513_v48 = vpop.f32.mrb[22].mxu1  ;;  %v3807_v22 = vld [vmem:[#allocation2 + $0x288] ss:$12 sps:$4 sm:$0xff]   ;;  %v3812_v27 = vld [vmem:[#allocation2 + $0x2a4] ss:$12 sps:$4 sm:$0xff]  }
 0x11a   :  { %v361_v34 = vadd.f32 %v360_v32, %v4186_v15  ;;  %v362_v36 = vpop.f32.mrb[23].mxu0  ;;  %1580 = vmatmul.mubr.bf16.gmra.mrb[64].mxu0 %v802_v18  ;;  %1958 = vmatmul.mubr.bf16.gmra.mrb[96].mxu1 %v802_v18  ;;  %v698_v44 = vmax.f32 %v357_v26, 0.0  ;;  %v668_v52 = vmax.f32 %v510_v41, 0.0  ;;  %v514_v55 = vadd.f32 %v513_v48, %v4242_v43  ;;  %v515_v56 = vpop.f32.mrb[23].mxu1 }
 0x11b   :  { %v363_v39 = vadd.f32 %v362_v36, %v4191_v0  ;;  %1717 = vmatpush1.bf16.msra.mxu0 %v3794_v24  ;;  %v699_v50 = vmax.f32 %v359_v30, 0.0  ;;  %v669_v17 = vmax.f32 %v512_v47, 0.0  ;;  %v516_v60 = vadd.f32 %v515_v56, %v4246_v49 }
 0x11c   :  { %v702_v45 = vmax.f32 %v361_v34, 0.0  ;;  %1718 = vmatprep.subr.bf16.mxu0 %v3801_v28  ;;  %v672_v1 = vmax.f32 %v514_v55, 0.0 }
 0x11d   :  { %v703_v51 = vmax.f32 %v363_v39, 0.0  ;;  %v673_v5 = vmax.f32 %v516_v60, 0.0 }
 0x11e   :  { %v806_v59 = vpack.c.bf16 %v702_v45, %v698_v44  ;;  %v4273_v11 = vpack.c.bf16 %v672_v1, %v668_v52  ;;  %v3810_v45 = vld [vmem:[#allocation2 + $0x2a0] ss:$12 sps:$4 sm:$0xff]  }
 0x11f   :  { %v807_v61 = vpack.c.bf16 %v703_v51, %v699_v50  ;;  %v366_v62 = vpop.f32.mrb[24].mxu0  ;;  %1719 = vmatpush1.bf16.msra.mxu0 %v3799_v40  ;;  %v4276_v18 = vpack.c.bf16 %v673_v5, %v669_v17  ;;  %v519_v19 = vpop.f32.mrb[24].mxu1  ;;  %v3817_v51 = vld [vmem:[#allocation2 + $0x2bc] ss:$12 sps:$4 sm:$0xff]  }
 0x120   :  { %v367_v2 = vadd.f32 %v366_v62, %v4186_v15  ;;  %v368_v3 = vpop.f32.mrb[25].mxu0  ;;  %1720 = vmatprep.subr.bf16.mxu0 %v3804_v46  ;;  %v520_v23 = vadd.f32 %v519_v19, %v4242_v43  ;;  %v521_v24 = vpop.f32.mrb[25].mxu1 }
 0x121   :  { %v369_v8 = vadd.f32 %v368_v3, %v4191_v0  ;;  %v370_v9 = vpop.f32.mrb[26].mxu0  ;;  %1589 = vmatprep.mubr.bf16.mxu0 %v807_v61  ;;  %1965 = vmatprep.mubr.bf16.mxu1 %v807_v61  ;;  %v522_v28 = vadd.f32 %v521_v24, %v4246_v49  ;;  %v523_v29 = vpop.f32.mrb[26].mxu1 }
 0x122   :  { %v371_v13 = vadd.f32 %v370_v9, %v4186_v15  ;;  %v372_v14 = vpop.f32.mrb[27].mxu0  ;;  %1590 = vmatmul.mubr.bf16.gmra.mrb[68].mxu0 %v806_v59  ;;  %1966 = vmatmul.mubr.bf16.gmra.mrb[100].mxu1 %v806_v59  ;;  %v706_v25 = vmax.f32 %v367_v2, 0.0  ;;  %v676_v34 = vmax.f32 %v520_v23, 0.0  ;;  %v524_v36 = vadd.f32 %v523_v29, %v4242_v43  ;;  %v525_v38 = vpop.f32.mrb[27].mxu1  ;;  %v3820_v9 = vld [vmem:[#allocation2 + $0x2d4] ss:$12 sps:$4 sm:$0xff]  }
 0x123   :  { %v373_v20 = vadd.f32 %v372_v14, %v4191_v0  ;;  %1721 = vmatpush1.bf16.msra.mxu0 %v3802_v63  ;;  %v707_v30 = vmax.f32 %v369_v8, 0.0  ;;  %v677_v40 = vmax.f32 %v522_v28, 0.0  ;;  %v526_v41 = vadd.f32 %v525_v38, %v4246_v49  ;;  %v3815_v63 = vld [vmem:[#allocation2 + $0x2b8] ss:$12 sps:$4 sm:$0xff]   ;;  %v3818_v29 = vld [vmem:[#allocation2 + $0x2d0] ss:$12 sps:$4 sm:$0xff]  }
 0x124   :  { %v710_v26 = vmax.f32 %v371_v13, 0.0  ;;  %1722 = vmatprep.subr.bf16.mxu0 %v3809_v4  ;;  %v680_v46 = vmax.f32 %v524_v36, 0.0  ;;  %v3825_v36 = vld [vmem:[#allocation2 + $0x2ec] ss:$12 sps:$4 sm:$0xff]  }
 0x125   :  { %v711_v32 = vmax.f32 %v373_v20, 0.0  ;;  %v681_v50 = vmax.f32 %v526_v41, 0.0 }
 0x126   :  { %v810_v39 = vpack.c.bf16 %v710_v26, %v706_v25  ;;  %v4285_v56 = vpack.c.bf16 %v680_v46, %v676_v34 }
 0x127   :  { %v811_v42 = vpack.c.bf16 %v711_v32, %v707_v30  ;;  %v376_v44 = vpop.f32.mrb[28].mxu0  ;;  %1723 = vmatpush1.bf16.msra.mxu0 %v3807_v22  ;;  %v4288_v60 = vpack.c.bf16 %v681_v50, %v677_v40  ;;  %v529_v61 = vpop.f32.mrb[28].mxu1  ;;  %v3823_v50 = vld [vmem:[#allocation2 + $0x2e8] ss:$12 sps:$4 sm:$0xff]  }
 0x128   :  { %v377_v47 = vadd.f32 %v376_v44, %v4186_v15  ;;  %v378_v48 = vpop.f32.mrb[29].mxu0  ;;  %1724 = vmatprep.subr.bf16.mxu0 %v3812_v27  ;;  %v530_v1 = vadd.f32 %v529_v61, %v4242_v43  ;;  %v531_v2 = vpop.f32.mrb[29].mxu1 }
 0x129   :  { %v379_v52 = vadd.f32 %v378_v48, %v4191_v0  ;;  %v380_v55 = vpop.f32.mrb[30].mxu0  ;;  %1599 = vmatprep.mubr.bf16.mxu0 %v811_v42  ;;  %1973 = vmatprep.mubr.bf16.mxu1 %v811_v42  ;;  %v532_v5 = vadd.f32 %v531_v2, %v4246_v49  ;;  %v533_v8 = vpop.f32.mrb[30].mxu1 }
 0x12a   :  { %v381_v59 = vadd.f32 %v380_v55, %v4186_v15  ;;  %v382_v17 = vpop.f32.mrb[31].mxu0  ;;  %1600 = vmatmul.mubr.bf16.gmra.mrb[72].mxu0 %v810_v39  ;;  %1974 = vmatmul.mubr.bf16.gmra.mrb[104].mxu1 %v810_v39  ;;  %v714_v3 = vmax.f32 %v377_v47, 0.0  ;;  %v684_v19 = vmax.f32 %v530_v1, 0.0  ;;  %v534_v20 = vadd.f32 %v533_v8, %v4242_v43  ;;  %v535_v22 = vpop.f32.mrb[31].mxu1 }
 0x12b   :  { %v383_v62 = vadd.f32 %v382_v17, %v4191_v0  ;;  %1725 = vmatpush1.bf16.msra.mxu0 %v3810_v45  ;;  %v715_v13 = vmax.f32 %v379_v52, 0.0  ;;  %v685_v24 = vmax.f32 %v532_v5, 0.0  ;;  %v536_v25 = vadd.f32 %v535_v22, %v4246_v49 }
 0x12c   :  { %v718_v4 = vmax.f32 %v381_v59, 0.0  ;;  %1726 = vmatprep.subr.bf16.mxu0 %v3817_v51  ;;  %v688_v28 = vmax.f32 %v534_v20, 0.0 }
 0x12d   :  { %v719_v14 = vmax.f32 %v383_v62, 0.0  ;;  %v689_v34 = vmax.f32 %v536_v25, 0.0 }
 0x12e   :  { %v814_v23 = vpack.c.bf16 %v718_v4, %v714_v3  ;;  %v4297_v40 = vpack.c.bf16 %v688_v28, %v684_v19 }
 0x12f   :  { %v815_v26 = vpack.c.bf16 %v719_v14, %v715_v13  ;;  %v386_v27 = vpop.f32.mrb[32].mxu0  ;;  %1727 = vmatpush1.bf16.msra.mxu0 %v3815_v63  ;;  %v4300_v44 = vpack.c.bf16 %v689_v34, %v685_v24  ;;  %v539_v45 = vpop.f32.mrb[32].mxu1 }
 0x130   :  { %v387_v30 = vadd.f32 %v386_v27, %v4186_v15  ;;  %v388_v32 = vpop.f32.mrb[33].mxu0  ;;  %1728 = vmatprep.subr.bf16.mxu0 %v3820_v9  ;;  %v540_v47 = vadd.f32 %v539_v45, %v4242_v43  ;;  %v541_v48 = vpop.f32.mrb[33].mxu1 }
 0x131   :  { %v389_v38 = vadd.f32 %v388_v32, %v4191_v0  ;;  %v390_v39 = vpop.f32.mrb[34].mxu0  ;;  %1609 = vmatprep.mubr.bf16.mxu0 %v815_v26  ;;  %1981 = vmatprep.mubr.bf16.mxu1 %v815_v26  ;;  %v542_v55 = vadd.f32 %v541_v48, %v4246_v49  ;;  %v543_v59 = vpop.f32.mrb[34].mxu1 }
 0x132   :  { %v391_v41 = vadd.f32 %v390_v39, %v4186_v15  ;;  %v392_v42 = vpop.f32.mrb[35].mxu0  ;;  %1610 = vmatmul.mubr.bf16.gmra.mrb[76].mxu0 %v814_v23  ;;  %1982 = vmatmul.mubr.bf16.gmra.mrb[108].mxu1 %v814_v23  ;;  %v722_v51 = vmax.f32 %v387_v30, 0.0  ;;  %v692_v62 = vmax.f32 %v540_v47, 0.0  ;;  %v544_v63 = vadd.f32 %v543_v59, %v4242_v43  ;;  %v545_v1 = vpop.f32.mrb[35].mxu1 }
 0x133   :  { %v393_v46 = vadd.f32 %v392_v42, %v4191_v0  ;;  %1729 = vmatpush1.bf16.msra.mxu0 %v3818_v29  ;;  %v723_v17 = vmax.f32 %v389_v38, 0.0  ;;  %v693_v3 = vmax.f32 %v542_v55, 0.0  ;;  %v546_v4 = vadd.f32 %v545_v1, %v4246_v49 }
 0x134   :  { %v726_v52 = vmax.f32 %v391_v41, 0.0  ;;  %1730 = vmatprep.subr.bf16.mxu0 %v3825_v36  ;;  %v696_v9 = vmax.f32 %v544_v63, 0.0 }
 0x135   :  { %v727_v61 = vmax.f32 %v393_v46, 0.0  ;;  %v697_v19 = vmax.f32 %v546_v4, 0.0 }
 0x136   :  { %v818_v2 = vpack.c.bf16 %v726_v52, %v722_v51  ;;  %v4309_v23 = vpack.c.bf16 %v696_v9, %v692_v62 }
 0x137   :  { %v819_v5 = vpack.c.bf16 %v727_v61, %v723_v17  ;;  %v396_v8 = vpop.f32.mrb[36].mxu0  ;;  %1731 = vmatpush1.bf16.msra.mxu0 %v3823_v50  ;;  %v4312_v26 = vpack.c.bf16 %v697_v19, %v693_v3  ;;  %v549_v27 = vpop.f32.mrb[36].mxu1 }
 0x138   :  { %v397_v13 = vadd.f32 %v396_v8, %v4186_v15  ;;  %v398_v14 = vpop.f32.mrb[37].mxu0  ;;  %v550_v29 = vadd.f32 %v549_v27, %v4242_v43  ;;  %v551_v30 = vpop.f32.mrb[37].mxu1 }
 0x139   :  { %v399_v20 = vadd.f32 %v398_v14, %v4191_v0  ;;  %v400_v22 = vpop.f32.mrb[38].mxu0  ;;  %1619 = vmatprep.mubr.bf16.mxu0 %v819_v5  ;;  %1989 = vmatprep.mubr.bf16.mxu1 %v819_v5  ;;  %v552_v36 = vadd.f32 %v551_v30, %v4246_v49  ;;  %v553_v38 = vpop.f32.mrb[38].mxu1 }
 0x13a   :  { %v401_v24 = vadd.f32 %v400_v22, %v4186_v15  ;;  %v402_v25 = vpop.f32.mrb[39].mxu0  ;;  %1620 = vmatmul.mubr.bf16.gmra.mrb[80].mxu0 %v818_v2  ;;  %1990 = vmatmul.mubr.bf16.gmra.mrb[112].mxu1 %v818_v2  ;;  %v730_v32 = vmax.f32 %v397_v13, 0.0  ;;  %v700_v42 = vmax.f32 %v550_v29, 0.0  ;;  %v554_v45 = vadd.f32 %v553_v38, %v4242_v43  ;;  %v555_v46 = vpop.f32.mrb[39].mxu1 }
 0x13b   :  { %v403_v28 = vadd.f32 %v402_v25, %v4191_v0  ;;  %v731_v39 = vmax.f32 %v399_v20, 0.0  ;;  %v701_v48 = vmax.f32 %v552_v36, 0.0  ;;  %v556_v50 = vadd.f32 %v555_v46, %v4246_v49 }
 0x13c   :  { %v734_v34 = vmax.f32 %v401_v24, 0.0  ;;  %v704_v55 = vmax.f32 %v554_v45, 0.0 }
 0x13d   :  { %v735_v41 = vmax.f32 %v403_v28, 0.0  ;;  %v705_v61 = vmax.f32 %v556_v50, 0.0 }
 0x13e   :  { %v822_v47 = vpack.c.bf16 %v734_v34, %v730_v32  ;;  %v4321_v1 = vpack.c.bf16 %v704_v55, %v700_v42 }
 0x13f   :  { %v823_v51 = vpack.c.bf16 %v735_v41, %v731_v39  ;;  %v406_v52 = vpop.f32.mrb[40].mxu0  ;;  %v4324_v4 = vpack.c.bf16 %v705_v61, %v701_v48  ;;  %v559_v5 = vpop.f32.mrb[40].mxu1 }
 0x140   :  { %v407_v59 = vadd.f32 %v406_v52, %v4186_v15  ;;  %v408_v17 = vpop.f32.mrb[41].mxu0  ;;  %v560_v9 = vadd.f32 %v559_v5, %v4242_v43  ;;  %v561_v13 = vpop.f32.mrb[41].mxu1 }
 0x141   :  { %v409_v62 = vadd.f32 %v408_v17, %v4191_v0  ;;  %v410_v63 = vpop.f32.mrb[42].mxu0  ;;  %1629 = vmatprep.mubr.bf16.mxu0 %v823_v51  ;;  %1997 = vmatprep.mubr.bf16.mxu1 %v823_v51  ;;  %v562_v20 = vadd.f32 %v561_v13, %v4246_v49  ;;  %v563_v22 = vpop.f32.mrb[42].mxu1 }
 0x142   :  { %v411_v2 = vadd.f32 %v410_v63, %v4186_v15  ;;  %v412_v3 = vpop.f32.mrb[43].mxu0  ;;  %1630 = vmatmul.mubr.bf16.gmra.mrb[84].mxu0 %v822_v47  ;;  %1998 = vmatmul.mubr.bf16.gmra.mrb[116].mxu1 %v822_v47  ;;  %v738_v14 = vmax.f32 %v407_v59, 0.0  ;;  %v708_v27 = vmax.f32 %v560_v9, 0.0  ;;  %v564_v28 = vadd.f32 %v563_v22, %v4242_v43  ;;  %v565_v29 = vpop.f32.mrb[43].mxu1 }
 0x143   :  { %v413_v8 = vadd.f32 %v412_v3, %v4191_v0  ;;  %v739_v24 = vmax.f32 %v409_v62, 0.0  ;;  %v709_v32 = vmax.f32 %v562_v20, 0.0  ;;  %v566_v34 = vadd.f32 %v565_v29, %v4246_v49 }
 0x144   :  { %v742_v19 = vmax.f32 %v411_v2, 0.0  ;;  %v712_v39 = vmax.f32 %v564_v28, 0.0 }
 0x145   :  { %v743_v25 = vmax.f32 %v413_v8, 0.0  ;;  %v713_v45 = vmax.f32 %v566_v34, 0.0 }
 0x146   :  { %v826_v30 = vpack.c.bf16 %v742_v19, %v738_v14  ;;  %v4333_v48 = vpack.c.bf16 %v712_v39, %v708_v27 }
 0x147   :  { %v827_v36 = vpack.c.bf16 %v743_v25, %v739_v24  ;;  %v416_v38 = vpop.f32.mrb[44].mxu0  ;;  %v4336_v52 = vpack.c.bf16 %v713_v45, %v709_v32  ;;  %v569_v55 = vpop.f32.mrb[44].mxu1 }
 0x148   :  { %v417_v41 = vadd.f32 %v416_v38, %v4186_v15  ;;  %v418_v42 = vpop.f32.mrb[45].mxu0  ;;  %v570_v17 = vadd.f32 %v569_v55, %v4242_v43  ;;  %v571_v61 = vpop.f32.mrb[45].mxu1 }
 0x149   :  { %v419_v46 = vadd.f32 %v418_v42, %v4191_v0  ;;  %v420_v47 = vpop.f32.mrb[46].mxu0  ;;  %1639 = vmatprep.mubr.bf16.mxu0 %v827_v36  ;;  %2005 = vmatprep.mubr.bf16.mxu1 %v827_v36  ;;  %v572_v2 = vadd.f32 %v571_v61, %v4246_v49  ;;  %v573_v3 = vpop.f32.mrb[46].mxu1 }
 0x14a   :  { %v421_v50 = vadd.f32 %v420_v47, %v4186_v15  ;;  %v422_v51 = vpop.f32.mrb[47].mxu0  ;;  %1640 = vmatmul.mubr.bf16.gmra.mrb[88].mxu0 %v826_v30  ;;  %2006 = vmatmul.mubr.bf16.gmra.mrb[120].mxu1 %v826_v30  ;;  %v746_v62 = vmax.f32 %v417_v41, 0.0  ;;  %v716_v9 = vmax.f32 %v570_v17, 0.0  ;;  %v574_v15 = vadd.f32 %v573_v3, %v4242_v43  ;;  %v575_v13 = vpop.f32.mrb[47].mxu1 }
 0x14b   :  { %v423_v59 = vadd.f32 %v422_v51, %v4191_v0  ;;  %v747_v5 = vmax.f32 %v419_v46, 0.0  ;;  %v717_v19 = vmax.f32 %v572_v2, 0.0  ;;  %v576_v20 = vadd.f32 %v575_v13, %v4246_v49 }
 0x14c   :  { %v750_v63 = vmax.f32 %v421_v50, 0.0  ;;  %v720_v0 = vmax.f32 %v574_v15, 0.0 }
 0x14d   :  { %v751_v8 = vmax.f32 %v423_v59, 0.0  ;;  %v721_v24 = vmax.f32 %v576_v20, 0.0 }
 0x14e   :  { %v830_v14 = vpack.c.bf16 %v750_v63, %v746_v62  ;;  %v4343_v25 = vpack.c.bf16 %v720_v0, %v716_v9 }
 0x14f   :  { %v831_v22 = vpack.c.bf16 %v751_v8, %v747_v5  ;;  %v4345_v27 = vpack.c.bf16 %v721_v24, %v717_v19  ;;  %v579_v28 = vpop.f32.mrb[48].mxu1 }
 0x150   :  { %v580_v29 = vadd.f32 %v579_v28, %v4242_v43  ;;  %v581_v30 = vpop.f32.mrb[49].mxu1 }
 0x151   :  { %1649 = vmatprep.mubr.bf16.mxu0 %v831_v22  ;;  %2013 = vmatprep.mubr.bf16.mxu1 %v831_v22  ;;  %v582_v32 = vadd.f32 %v581_v30, %v4246_v49  ;;  %v583_v34 = vpop.f32.mrb[50].mxu1 }
 0x152   :  { %1650 = vmatmul.mubr.bf16.gmra.mrb[92].mxu0 %v830_v14  ;;  %2014 = vmatmul.mubr.bf16.gmra.mrb[124].mxu1 %v830_v14  ;;  %v724_v36 = vmax.f32 %v580_v29, 0.0  ;;  %v584_v38 = vadd.f32 %v583_v34, %v4242_v43  ;;  %v585_v39 = vpop.f32.mrb[51].mxu1 }
 0x153   :  { %1659 = vmatprep.mubr.bf16.mxu0 %v4206_v57  ;;  %2021 = vmatprep.mubr.bf16.mxu1 %v4206_v57  ;;  %v725_v41 = vmax.f32 %v582_v32, 0.0  ;;  %v586_v42 = vadd.f32 %v585_v39, %v4246_v49  ;;  %v3826_v57 = vld [vmem:[%s4908_s5 + $0x40] sm:$0xff]  }
 0x154   :  { %v728_v45 = vmax.f32 %v584_v38, 0.0  ;;  %3350 = vmatprep.subr.bf16.mxu0 %v3826_v57 }
 0x155   :  { %v729_v46 = vmax.f32 %v586_v42, 0.0 }
 0x156   :  { %v4353_v47 = vpack.c.bf16 %v728_v45, %v724_v36 }
 0x157   :  { %v4360_v50 = vpack.c.bf16 %v729_v46, %v725_v41  ;;  %v589_v51 = vpop.f32.mrb[52].mxu1 }
 0x158   :  { %v590_v55 = vadd.f32 %v589_v51, %v4242_v43  ;;  %v591_v59 = vpop.f32.mrb[53].mxu1 }
 0x159   :  { %v592_v17 = vadd.f32 %v591_v59, %v4246_v49  ;;  %v593_v61 = vpop.f32.mrb[54].mxu1 }
 0x15a   :  { %1660 = vmatmul.mubr.bf16.gmra.mrb[96].mxu0 %v4203_v53  ;;  %2022 = vmatmul.mubr.bf16.gmra.mrb[128].mxu1 %v4203_v53  ;;  %v732_v62 = vmax.f32 %v590_v55, 0.0  ;;  %v594_v63 = vadd.f32 %v593_v61, %v4242_v43  ;;  %v595_v2 = vpop.f32.mrb[55].mxu1 }
 0x15b   :  { %1669 = vmatprep.mubr.bf16.mxu0 %v4218_v35  ;;  %2029 = vmatprep.mubr.bf16.mxu1 %v4218_v35  ;;  %v733_v3 = vmax.f32 %v592_v17, 0.0  ;;  %v596_v53 = vadd.f32 %v595_v2, %v4246_v49 }
 0x15c   :  { %v736_v5 = vmax.f32 %v594_v63, 0.0 }
 0x15d   :  { %v737_v8 = vmax.f32 %v596_v53, 0.0 }
 0x15e   :  { %v4368_v9 = vpack.c.bf16 %v736_v5, %v732_v62 }
 0x15f   :  { %v4372_v35 = vpack.c.bf16 %v737_v8, %v733_v3  ;;  %v599_v15 = vpop.f32.mrb[56].mxu1 }
 0x160   :  { %v600_v13 = vadd.f32 %v599_v15, %v4242_v43  ;;  %v601_v14 = vpop.f32.mrb[57].mxu1 }
 0x161   :  { %v602_v19 = vadd.f32 %v601_v14, %v4246_v49  ;;  %v603_v20 = vpop.f32.mrb[58].mxu1  ;;  %v3827_v14 = vld [vmem:[%s4908_s5] sm:$0xff]  }
 0x162   :  { %1670 = vmatmul.mubr.bf16.gmra.mrb[100].mxu0 %v4215_v31  ;;  %2030 = vmatmul.mubr.bf16.gmra.mrb[132].mxu1 %v4215_v31  ;;  %v740_v22 = vmax.f32 %v600_v13, 0.0  ;;  %v604_v0 = vadd.f32 %v603_v20, %v4242_v43  ;;  %v605_v24 = vpop.f32.mrb[59].mxu1 }
 0x163   :  { %1679 = vmatprep.mubr.bf16.mxu0 %v4230_v12  ;;  %2037 = vmatprep.mubr.bf16.mxu1 %v4230_v12  ;;  %v741_v28 = vmax.f32 %v602_v19, 0.0  ;;  %v606_v31 = vadd.f32 %v605_v24, %v4246_v49  ;;  %v3828_v19 = vld [vmem:[%s4908_s5 + $0x48] sm:$0xff]  }
 0x164   :  { %v744_v29 = vmax.f32 %v604_v0, 0.0 }
 0x165   :  { %v745_v30 = vmax.f32 %v606_v31, 0.0 }
 0x166   :  { %v4380_v32 = vpack.c.bf16 %v744_v29, %v740_v22  ;;  %v3829_v29 = vld [vmem:[%s4908_s5 + $0x8] sm:$0xff]  }
 0x167   :  { %v4384_v12 = vpack.c.bf16 %v745_v30, %v741_v28  ;;  %v609_v34 = vpop.f32.mrb[60].mxu1 }
 0x168   :  { %v610_v36 = vadd.f32 %v609_v34, %v4242_v43  ;;  %v611_v38 = vpop.f32.mrb[61].mxu1 }
 0x169   :  { %v612_v39 = vadd.f32 %v611_v38, %v4246_v49  ;;  %v613_v41 = vpop.f32.mrb[62].mxu1 }
 0x16a   :  { %1680 = vmatmul.mubr.bf16.gmra.mrb[104].mxu0 %v4227_v7  ;;  %2038 = vmatmul.mubr.bf16.gmra.mrb[136].mxu1 %v4227_v7  ;;  %v748_v42 = vmax.f32 %v610_v36, 0.0  ;;  %v614_v45 = vadd.f32 %v613_v41, %v4242_v43  ;;  %v615_v46 = vpop.f32.mrb[63].mxu1 }
 0x16b   :  { %1689 = vmatprep.mubr.bf16.mxu0 %v4252_v58  ;;  %2045 = vmatprep.mubr.bf16.mxu1 %v4252_v58  ;;  %v749_v57 = vmax.f32 %v612_v39, 0.0  ;;  %v616_v7 = vadd.f32 %v615_v46, %v4246_v49 }
 0x16c   :  { %v752_v51 = vmax.f32 %v614_v45, 0.0 }
 0x16d   :  { %v753_v55 = vmax.f32 %v616_v7, 0.0 }
 0x16e   :  { %v4392_v59 = vpack.c.bf16 %v752_v51, %v748_v42  ;;  %v3831_v42 = vld [vmem:[%s4908_s5 + $0x10] sm:$0xff]  }
 0x16f   :  { %v4396_v58 = vpack.c.bf16 %v753_v55, %v749_v57  ;;  %v619_v17 = vpop.f32.mrb[64].mxu1 }
 0x170   :  { %v620_v61 = vadd.f32 %v619_v17, %v4242_v43  ;;  %v621_v62 = vpop.f32.mrb[65].mxu1 }
 0x171   :  { %v622_v63 = vadd.f32 %v621_v62, %v4246_v49  ;;  %v623_v2 = vpop.f32.mrb[66].mxu1 }
 0x172   :  { %1690 = vmatmul.mubr.bf16.gmra.mrb[108].mxu0 %v4249_v54  ;;  %2046 = vmatmul.mubr.bf16.gmra.mrb[140].mxu1 %v4249_v54  ;;  %v756_v3 = vmax.f32 %v620_v61, 0.0  ;;  %v624_v53 = vadd.f32 %v623_v2, %v4242_v43  ;;  %v625_v5 = vpop.f32.mrb[67].mxu1 }
 0x173   :  { %1732 = vmatprep.mubr.bf16.mxu0 %v4264_v37  ;;  %2086 = vmatprep.mubr.bf16.mxu1 %v4264_v37  ;;  %v757_v8 = vmax.f32 %v622_v63, 0.0  ;;  %v626_v54 = vadd.f32 %v625_v5, %v4246_v49 }
 0x174   :  { %v760_v15 = vmax.f32 %v624_v53, 0.0 }
 0x175   :  { %v761_v13 = vmax.f32 %v626_v54, 0.0 }
 0x176   :  { %v4407_v37 = vpack.c.bf16 %v760_v15, %v756_v3 }
 0x177   :  { %v4414_v20 = vpack.c.bf16 %v761_v13, %v757_v8  ;;  %v629_v22 = vpop.f32.mrb[68].mxu1 }
 0x178   :  { %v630_v0 = vadd.f32 %v629_v22, %v4242_v43  ;;  %v631_v24 = vpop.f32.mrb[69].mxu1 }
 0x179   :  { %v632_v28 = vadd.f32 %v631_v24, %v4246_v49  ;;  %v633_v31 = vpop.f32.mrb[70].mxu1 }
 0x17a   :  { %1733 = vmatmul.mubr.bf16.vlgmr.msra.gmra.mrb[48].mxu0 %v4261_v33  ;;  %2087 = vmatmul.mubr.bf16.vlgmr.msra.gmra.mrb[144].mxu1 %v4261_v33  ;;  %v764_v30 = vmax.f32 %v630_v0, 0.0  ;;  %v634_v33 = vadd.f32 %v633_v31, %v4242_v43  ;;  %v635_v34 = vpop.f32.mrb[71].mxu1 }
 0x17b   :  { %1742 = vmatprep.mubr.bf16.mxu0 %v4276_v18  ;;  %2094 = vmatprep.mubr.bf16.mxu1 %v4276_v18  ;;  %v3830_v18 = vld [vmem:[%s4908_s5 + $0x50] sm:$0xff]   ;;  %v765_v36 = vmax.f32 %v632_v28, 0.0  ;;  %v636_v38 = vadd.f32 %v635_v34, %v4246_v49 }
 0x17c   :  { %3351 = vmatpush3.bf16.msra.mxu0 %v3827_v14  ;;  %v768_v39 = vmax.f32 %v634_v33, 0.0  ;;  %v3833_v14 = vld [vmem:[%s4908_s5 + $0x18] sm:$0xff]  }
 0x17d   :  { %3352 = vmatprep.subr.bf16.mxu0 %v3828_v19  ;;  %v769_v41 = vmax.f32 %v636_v38, 0.0 }
 0x17e   :  { %v4431_v45 = vpack.c.bf16 %v768_v39, %v764_v30 }
 0x17f   :  { %v4435_v46 = vpack.c.bf16 %v769_v41, %v765_v36  ;;  %v639_v57 = vpop.f32.mrb[72].mxu1 }
 0x180   :  { %3353 = vmatpush3.bf16.msra.mxu0 %v3829_v29  ;;  %v640_v7 = vadd.f32 %v639_v57, %v4242_v43  ;;  %v641_v51 = vpop.f32.mrb[73].mxu1 }
 0x181   :  { %3354 = vmatprep.subr.bf16.mxu0 %v3830_v18  ;;  %v642_v55 = vadd.f32 %v641_v51, %v4246_v49  ;;  %v643_v17 = vpop.f32.mrb[74].mxu1  ;;  %v3847_v18 = vld [vmem:[%s4908_s5 + $0xa8] sm:$0xff]  }
 0x182   :  { %1743 = vmatmul.mubr.bf16.gmra.mrb[52].mxu0 %v4273_v11  ;;  %2095 = vmatmul.mubr.bf16.gmra.mrb[148].mxu1 %v4273_v11  ;;  %v772_v61 = vmax.f32 %v640_v7, 0.0  ;;  %v644_v62 = vadd.f32 %v643_v17, %v4242_v43  ;;  %v645_v63 = vpop.f32.mrb[75].mxu1 }
 0x183   :  { %1752 = vmatprep.mubr.bf16.mxu0 %v4288_v60  ;;  %2102 = vmatprep.mubr.bf16.mxu1 %v4288_v60  ;;  %v773_v2 = vmax.f32 %v642_v55, 0.0  ;;  %v646_v11 = vadd.f32 %v645_v63, %v4246_v49  ;;  %v3832_v60 = vld [vmem:[%s4908_s5 + $0x58] sm:$0xff]  }
 0x184   :  { %3355 = vmatpush3.bf16.msra.mxu0 %v3831_v42  ;;  %v776_v3 = vmax.f32 %v644_v62, 0.0  ;;  %v3848_v42 = vld [vmem:[%s4908_s5 + $0xb0] sm:$0xff]  }
 0x185   :  { %v777_v53 = vmax.f32 %v646_v11, 0.0  ;;  %3356 = vmatprep.subr.bf16.mxu0 %v3832_v60 }
 0x186   :  { %v4443_v5 = vpack.c.bf16 %v776_v3, %v772_v61 }
 0x187   :  { %v4450_v8 = vpack.c.bf16 %v777_v53, %v773_v2  ;;  %v649_v54 = vpop.f32.mrb[76].mxu1 }
 0x188   :  { %v650_v15 = vadd.f32 %v649_v54, %v4242_v43  ;;  %v651_v13 = vpop.f32.mrb[77].mxu1  ;;  %3357 = vmatpush3.bf16.msra.mxu0 %v3833_v14 }
 0x189   :  { %v652_v19 = vadd.f32 %v651_v13, %v4246_v49  ;;  %v653_v22 = vpop.f32.mrb[78].mxu1 }
 0x18a   :  { %1753 = vmatmul.mubr.bf16.gmra.mrb[56].mxu0 %v4285_v56  ;;  %2103 = vmatmul.mubr.bf16.gmra.mrb[152].mxu1 %v4285_v56  ;;  %v780_v0 = vmax.f32 %v650_v15, 0.0  ;;  %v654_v56 = vadd.f32 %v653_v22, %v4242_v43  ;;  %v655_v24 = vpop.f32.mrb[79].mxu1  ;;  %v3834_v43 = vld [vmem:[%s4908_s5 + $0x60] sm:$0xff]  }
 0x18b   :  { %1762 = vmatprep.mubr.bf16.mxu0 %v4300_v44  ;;  %2110 = vmatprep.mubr.bf16.mxu1 %v4300_v44  ;;  %v781_v28 = vmax.f32 %v652_v19, 0.0  ;;  %v656_v31 = vadd.f32 %v655_v24, %v4246_v49  ;;  %v3835_v49 = vld [vmem:[%s4908_s5 + $0x20] sm:$0xff]  }
 0x18c   :  { %v784_v44 = vmax.f32 %v654_v56, 0.0  ;;  %3358 = vmatprep.subr.bf16.mxu0 %v3834_v43 }
 0x18d   :  { %v785_v29 = vmax.f32 %v656_v31, 0.0  ;;  %3359 = vmatpush3.bf16.msra.mxu0 %v3835_v49 }
 0x18e   :  { %v4461_v30 = vpack.c.bf16 %v784_v44, %v780_v0 }
 0x18f   :  { %v4465_v33 = vpack.c.bf16 %v785_v29, %v781_v28 }
 0x192   :  { %1763 = vmatmul.mubr.bf16.gmra.mrb[60].mxu0 %v4297_v40  ;;  %2111 = vmatmul.mubr.bf16.gmra.mrb[156].mxu1 %v4297_v40  ;;  %v3836_v40 = vld [vmem:[%s4908_s5 + $0x80] sm:$0xff]  }
 0x193   :  { %1772 = vmatprep.mubr.bf16.mxu0 %v4312_v26  ;;  %2118 = vmatprep.mubr.bf16.mxu1 %v4312_v26  ;;  %v3838_v26 = vld [vmem:[%s4908_s5 + $0x28] sm:$0xff]  }
 0x194   :  { %3486 = vmatprep.subr.bf16.mxu1 %v3836_v40 }
 0x195   :  { %3487 = vmatpush3.bf16.msra.mxu1 %v3836_v40 }
 0x19a   :  { %1773 = vmatmul.mubr.bf16.gmra.mrb[64].mxu0 %v4309_v23  ;;  %2119 = vmatmul.mubr.bf16.gmra.mrb[160].mxu1 %v4309_v23  ;;  %v3837_v23 = vld [vmem:[%s4908_s5 + $0x68] sm:$0xff]  }
 0x19b   :  { %1782 = vmatprep.mubr.bf16.mxu0 %v4324_v4  ;;  %2126 = vmatprep.mubr.bf16.mxu1 %v4324_v4  ;;  %v3840_v4 = vld [vmem:[%s4908_s5 + $0x70] sm:$0xff]  }
 0x19c   :  { %3360 = vmatprep.subr.bf16.mxu0 %v3837_v23 }
 0x19d   :  { %3361 = vmatpush3.bf16.msra.mxu0 %v3838_v26 }
 0x19e   :  { %3362 = vmatprep.subr.bf16.mxu0 %v3840_v4 }
 0x1a2   :  { %1783 = vmatmul.mubr.bf16.gmra.mrb[68].mxu0 %v4321_v1  ;;  %2127 = vmatmul.mubr.bf16.gmra.mrb[164].mxu1 %v4321_v1  ;;  %v3839_v1 = vld [vmem:[%s4908_s5 + $0x88] sm:$0xff]  }
 0x1a3   :  { %1792 = vmatprep.mubr.bf16.mxu0 %v4336_v52  ;;  %2134 = vmatprep.mubr.bf16.mxu1 %v4336_v52  ;;  %v3842_v52 = vld [vmem:[%s4908_s5 + $0x90] sm:$0xff]  }
 0x1a4   :  { %3488 = vmatprep.subr.bf16.mxu1 %v3839_v1 }
 0x1a5   :  { %3489 = vmatpush3.bf16.msra.mxu1 %v3839_v1 }
 0x1a6   :  { %3490 = vmatprep.subr.bf16.mxu1 %v3842_v52 }
 0x1a9   :  { %3491 = vmatpush3.bf16.msra.mxu1 %v3842_v52 }
 0x1aa   :  { %1793 = vmatmul.mubr.bf16.gmra.mrb[72].mxu0 %v4333_v48  ;;  %2135 = vmatmul.mubr.bf16.gmra.mrb[168].mxu1 %v4333_v48  ;;  %v3841_v48 = vld [vmem:[%s4908_s5 + $0x30] sm:$0xff]  }
 0x1ab   :  { %1802 = vmatprep.mubr.bf16.mxu0 %v4345_v27  ;;  %2142 = vmatprep.mubr.bf16.mxu1 %v4345_v27  ;;  %v3844_v27 = vld [vmem:[%s4908_s5 + $0x38] sm:$0xff]  }
 0x1ac   :  { %3363 = vmatpush3.bf16.msra.mxu0 %v3841_v48 }
 0x1b2   :  { %1803 = vmatmul.mubr.bf16.gmra.mrb[76].mxu0 %v4343_v25  ;;  %2143 = vmatmul.mubr.bf16.gmra.mrb[172].mxu1 %v4343_v25  ;;  %v3843_v25 = vld [vmem:[%s4908_s5 + $0x78] sm:$0xff]  }
 0x1b3   :  { %1812 = vmatprep.mubr.bf16.mxu0 %v4360_v50  ;;  %2150 = vmatprep.mubr.bf16.mxu1 %v4360_v50 }
 0x1b4   :  { %3364 = vmatprep.subr.bf16.mxu0 %v3843_v25 }
 0x1b5   :  { %3365 = vmatpush3.bf16.msra.mxu0 %v3844_v27 }
 0x1ba   :  { %1813 = vmatmul.mubr.bf16.gmra.mrb[80].mxu0 %v4353_v47  ;;  %2151 = vmatmul.mubr.bf16.gmra.mrb[176].mxu1 %v4353_v47  ;;  %v3845_v47 = vld [vmem:[%s4908_s5 + $0x98] sm:$0xff]  }
 0x1bb   :  { %1822 = vmatprep.mubr.bf16.mxu0 %v4372_v35  ;;  %2158 = vmatprep.mubr.bf16.mxu1 %v4372_v35 }
 0x1bc   :  { %3492 = vmatprep.subr.bf16.mxu1 %v3845_v47 }
 0x1bd   :  { %3493 = vmatpush3.bf16.msra.mxu1 %v3845_v47 }
 0x1c2   :  { %1823 = vmatmul.mubr.bf16.gmra.mrb[84].mxu0 %v4368_v9  ;;  %2159 = vmatmul.mubr.bf16.gmra.mrb[180].mxu1 %v4368_v9 }
 0x1c3   :  { %1832 = vmatprep.mubr.bf16.mxu0 %v4384_v12  ;;  %2166 = vmatprep.mubr.bf16.mxu1 %v4384_v12  ;;  %v3846_v12 = vld [vmem:[%s4908_s5 + $0xa0] sm:$0xff]  }
 0x1c4   :  { %3494 = vmatprep.subr.bf16.mxu1 %v3846_v12 }
 0x1c5   :  { %3495 = vmatpush3.bf16.msra.mxu1 %v3846_v12 }
 0x1c6   :  { %3496 = vmatprep.subr.bf16.mxu1 %v3847_v18 }
 0x1c9   :  { %3497 = vmatpush3.bf16.msra.mxu1 %v3847_v18 }
 0x1ca   :  { %1833 = vmatmul.mubr.bf16.gmra.mrb[88].mxu0 %v4380_v32  ;;  %2167 = vmatmul.mubr.bf16.gmra.mrb[184].mxu1 %v4380_v32 }
 0x1cb   :  { %1842 = vmatprep.mubr.bf16.mxu0 %v4396_v58  ;;  %2174 = vmatprep.mubr.bf16.mxu1 %v4396_v58 }
 0x1cc   :  { %3498 = vmatprep.subr.bf16.mxu1 %v3848_v42 }
 0x1cd   :  { %v3142_v50 = vpop.f32.mrb[80].mxu1  ;;  %3499 = vmatpush3.bf16.msra.mxu1 %v3848_v42 }
 0x1ce   :  { %v3143_v9 = vpop.f32.mrb[81].mxu1 }
 0x1cf   :  { %v4533_v35 = vadd.f32 %v3143_v9, %v3142_v50  ;;  %v3145_v32 = vpop.f32.mrb[82].mxu1 }
 0x1d0   :  { %v3146_v58 = vpop.f32.mrb[83].mxu1 }
 0x1d1   :  { %v4538_v34 = vadd.f32 %v3146_v58, %v3145_v32 }
 0x1d2   :  { %1843 = vmatmul.mubr.bf16.gmra.mrb[92].mxu0 %v4392_v59  ;;  %2175 = vmatmul.mubr.bf16.gmra.mrb[188].mxu1 %v4392_v59 }
 0x1d3   :  { %1852 = vmatprep.mubr.bf16.mxu0 %v4414_v20  ;;  %2182 = vmatprep.mubr.bf16.mxu1 %v4414_v20  ;;  %v3849_v20 = vld [vmem:[%s4908_s5 + $0xb8] sm:$0xff]  }
 0x1d4   :  { %3500 = vmatprep.subr.bf16.mxu1 %v3849_v20 }
 0x1d5   :  { %v3148_v36 = vpop.f32.mrb[84].mxu1  ;;  %3501 = vmatpush3.bf16.msra.mxu1 %v3849_v20 }
 0x1d6   :  { %v3149_v38 = vpop.f32.mrb[85].mxu1 }
 0x1d7   :  { %v4547_v39 = vadd.f32 %v3149_v38, %v3148_v36  ;;  %v3151_v41 = vpop.f32.mrb[86].mxu1 }
 0x1d8   :  { %v3152_v59 = vpop.f32.mrb[87].mxu1 }
 0x1d9   :  { %v4552_v57 = vadd.f32 %v3152_v59, %v3151_v41 }
 0x1da   :  { %1853 = vmatmul.mubr.bf16.gmra.mrb[96].mxu0 %v4407_v37  ;;  %2183 = vmatmul.mubr.bf16.gmra.mrb[192].mxu1 %v4407_v37 }
 0x1db   :  { %1862 = vmatprep.mubr.bf16.mxu0 %v4435_v46  ;;  %2190 = vmatprep.mubr.bf16.mxu1 %v4435_v46 }
 0x1dd   :  { %v3154_v7 = vpop.f32.mrb[88].mxu1 }
 0x1de   :  { %v3155_v51 = vpop.f32.mrb[89].mxu1 }
 0x1df   :  { %v4561_v55 = vadd.f32 %v3155_v51, %v3154_v7  ;;  %v3157_v17 = vpop.f32.mrb[90].mxu1 }
 0x1e0   :  { %v3158_v61 = vpop.f32.mrb[91].mxu1 }
 0x1e1   :  { %v4563_v62 = vadd.f32 %v3158_v61, %v3157_v17 }
 0x1e2   :  { %1863 = vmatmul.mubr.bf16.gmra.mrb[100].mxu0 %v4431_v45  ;;  %2191 = vmatmul.mubr.bf16.gmra.mrb[196].mxu1 %v4431_v45 }
 0x1e3   :  { %1872 = vmatprep.mubr.bf16.mxu0 %v4450_v8  ;;  %2198 = vmatprep.mubr.bf16.mxu1 %v4450_v8 }
 0x1e5   :  { %v3160_v37 = vpop.f32.mrb[92].mxu1 }
 0x1e6   :  { %v3161_v46 = vpop.f32.mrb[93].mxu1 }
 0x1e7   :  { %v4569_v63 = vadd.f32 %v3161_v46, %v3160_v37  ;;  %v3163_v2 = vpop.f32.mrb[94].mxu1 }
 0x1e8   :  { %v3164_v11 = vpop.f32.mrb[95].mxu1 }
 0x1e9   :  { %v4571_v3 = vadd.f32 %v3164_v11, %v3163_v2 }
 0x1ea   :  { %1873 = vmatmul.mubr.bf16.gmra.mrb[104].mxu0 %v4443_v5  ;;  %2199 = vmatmul.mubr.bf16.gmra.mrb[200].mxu1 %v4443_v5 }
 0x1eb   :  { %1882 = vmatprep.mubr.bf16.mxu0 %v4465_v33  ;;  %2206 = vmatprep.mubr.bf16.mxu1 %v4465_v33 }
 0x1ed   :  { %v3166_v45 = vpop.f32.mrb[96].mxu1 }
 0x1ee   :  { %v3167_v53 = vpop.f32.mrb[97].mxu1 }
 0x1ef   :  { %v4577_v60 = vadd.f32 %v3167_v53, %v3166_v45  ;;  %v3169_v8 = vpop.f32.mrb[98].mxu1 }
 0x1f0   :  { %v3170_v54 = vpop.f32.mrb[99].mxu1 }
 0x1f1   :  { %v4579_v15 = vadd.f32 %v3170_v54, %v3169_v8 }
 0x1f2   :  { %1883 = vmatmul.mubr.bf16.gmra.mrb[108].mxu0 %v4461_v30  ;;  %2207 = vmatmul.mubr.bf16.gmra.mrb[204].mxu1 %v4461_v30 }
 0x1f5   :  { %v3172_v13 = vpop.f32.mrb[100].mxu1 }
 0x1f6   :  { %v3173_v14 = vpop.f32.mrb[101].mxu1 }
 0x1f7   :  { %v4583_v19 = vadd.f32 %v3173_v14, %v3172_v13  ;;  %v3175_v5 = vpop.f32.mrb[102].mxu1 }
 0x1f8   :  { %v3176_v22 = vpop.f32.mrb[103].mxu1 }
 0x1f9   :  { %v4585_v0 = vadd.f32 %v3176_v22, %v3175_v5 }
 0x1fd   :  { %v3178_v56 = vpop.f32.mrb[104].mxu1 }
 0x1fe   :  { %v3179_v24 = vpop.f32.mrb[105].mxu1 }
 0x1ff   :  { %v4587_v28 = vadd.f32 %v3179_v24, %v3178_v56  ;;  %v3181_v31 = vpop.f32.mrb[106].mxu1 }
 0x200   :  { %v3182_v44 = vpop.f32.mrb[107].mxu1 }
 0x201   :  { %v4589_v29 = vadd.f32 %v3182_v44, %v3181_v31 }
 0x205   :  { %v3184_v33 = vpop.f32.mrb[108].mxu1 }
 0x206   :  { %v3185_v43 = vpop.f32.mrb[109].mxu1 }
 0x207   :  { %v4591_v49 = vadd.f32 %v3185_v43, %v3184_v33  ;;  %v3187_v30 = vpop.f32.mrb[110].mxu1 }
 0x208   :  { %v3188_v40 = vpop.f32.mrb[111].mxu1 }
 0x209   :  { %v4593_v23 = vadd.f32 %v3188_v40, %v3187_v30 }
 0x20d   :  { %v3190_v26 = vpop.f32.mrb[112].mxu1 }
 0x20e   :  { %v3191_v1 = vpop.f32.mrb[113].mxu1 }
 0x20f   :  { %v4595_v4 = vadd.f32 %v3191_v1, %v3190_v26  ;;  %v3193_v48 = vpop.f32.mrb[114].mxu1 }
 0x210   :  { %v3194_v52 = vpop.f32.mrb[115].mxu1 }
 0x211   :  { %v4597_v25 = vadd.f32 %v3194_v52, %v3193_v48  ;;  %v978_v48 = vld [vmem:[%s4907_s4] sm:$0x7] }
 0x215   :  { %v3196_v27 = vpop.f32.mrb[116].mxu1 }
 0x216   :  { %v3197_v47 = vpop.f32.mrb[117].mxu1 }
 0x217   :  { %v4599_v50 = vadd.f32 %v3197_v47, %v3196_v27  ;;  %v3199_v9 = vpop.f32.mrb[118].mxu1  ;;  %v4632_v47 = vrot.slane %v978_v48, %v85_v6 }
 0x218   :  { %v3200_v32 = vpop.f32.mrb[119].mxu1 }
 0x219   :  { %v4601_v12 = vadd.f32 %v3200_v32, %v3199_v9  ;;  %v4636_v9 = vrot.slane %v978_v48, %v93_v21  ;;  %v4640_v32 = vrot.slane %v978_v48, %v89_v10 }
 0x21b   :  { %v1931_v10 = vadd.f32 %v4538_v34, %v4636_v9  ;;  %v1936_v34 = vadd.f32 %v4547_v39, %v4636_v9 }
 0x21d   :  { %v3202_v58 = vpop.f32.mrb[120].mxu1 }
 0x21e   :  { %v3203_v18 = vpop.f32.mrb[121].mxu1 }
 0x21f   :  { %v4603_v36 = vadd.f32 %v3203_v18, %v3202_v58  ;;  %v3205_v38 = vpop.f32.mrb[122].mxu1 }
 0x220   :  { %v3206_v41 = vpop.f32.mrb[123].mxu1 }
 0x221   :  { %v4605_v42 = vadd.f32 %v3206_v41, %v3205_v38 }
 0x225   :  { %v3208_v59 = vpop.f32.mrb[124].mxu1 }
 0x226   :  { %v3209_v20 = vpop.f32.mrb[125].mxu1 }
 0x227   :  { %v4607_v7 = vadd.f32 %v3209_v20, %v3208_v59  ;;  %v3211_v51 = vpop.f32.mrb[126].mxu1  ;;  %v1928_v20 = vadd.f32 %v4533_v35, %v4636_v9 }
 0x228   :  { %v3212_v17 = vpop.f32.mrb[127].mxu1 }
 0x229   :  { %v4609_v61 = vadd.f32 %v3212_v17, %v3211_v51 }
 0x22d   :  { %v3214_v37 = vpop.f32.mrb[128].mxu1 }
 0x22e   :  { %v3215_v46 = vpop.f32.mrb[129].mxu1 }
 0x22f   :  { %v4611_v2 = vadd.f32 %v3215_v46, %v3214_v37  ;;  %v3217_v11 = vpop.f32.mrb[130].mxu1 }
 0x230   :  { %v3218_v45 = vpop.f32.mrb[131].mxu1 }
 0x231   :  { %v4613_v53 = vadd.f32 %v3218_v45, %v3217_v11 }
 0x235   :  { %v3220_v8 = vpop.f32.mrb[132].mxu1 }
 0x236   :  { %v3221_v54 = vpop.f32.mrb[133].mxu1 }
 0x237   :  { %v4615_v13 = vadd.f32 %v3221_v54, %v3220_v8  ;;  %v3223_v14 = vpop.f32.mrb[134].mxu1 }
 0x238   :  { %v3224_v5 = vpop.f32.mrb[135].mxu1 }
 0x239   :  { %v4617_v22 = vadd.f32 %v3224_v5, %v3223_v14 }
 0x23d   :  { %v3226_v56 = vpop.f32.mrb[136].mxu1 }
 0x23e   :  { %v3227_v24 = vpop.f32.mrb[137].mxu1 }
 0x23f   :  { %v4619_v31 = vadd.f32 %v3227_v24, %v3226_v56  ;;  %v3229_v44 = vpop.f32.mrb[138].mxu1 }
 0x240   :  { %v3230_v33 = vpop.f32.mrb[139].mxu1 }
 0x241   :  { %v4621_v43 = vadd.f32 %v3230_v33, %v3229_v44 }
 0x245   :  { %v3232_v30 = vpop.f32.mrb[140].mxu1 }
 0x246   :  { %v3233_v40 = vpop.f32.mrb[141].mxu1 }
 0x247   :  { %v4623_v26 = vadd.f32 %v3233_v40, %v3232_v30  ;;  %v3235_v1 = vpop.f32.mrb[142].mxu1 }
 0x248   :  { %v3236_v52 = vpop.f32.mrb[143].mxu1 }
 0x249   :  { %v4628_v27 = vadd.f32 %v3236_v52, %v3235_v1 }
 0x24d   :  { %v1734_v58 = vpop.f32.mrb[48].mxu0  ;;  %v3254_v18 = vpop.f32.mrb[144].mxu1 }
 0x24e   :  { %v3538_v38 = vadd.f32 %v1734_v58, %v4632_v47  ;;  %v1736_v41 = vpop.f32.mrb[49].mxu0  ;;  %v3255_v59 = vpop.f32.mrb[145].mxu1 }
 0x24f   :  { %v3539_v6 = vadd.f32 %v1736_v41, %v4640_v32  ;;  %v3256_v51 = vadd.f32 %v3255_v59, %v3254_v18  ;;  %v1738_v17 = vpop.f32.mrb[50].mxu0  ;;  %v3257_v37 = vpop.f32.mrb[146].mxu1 }
 0x250   :  { %v3540_v21 = vadd.f32 %v1738_v17, %v4632_v47  ;;  %v1740_v46 = vpop.f32.mrb[51].mxu0  ;;  %v3258_v16 = vpop.f32.mrb[147].mxu1  ;;  %v2215_v54 = vmax.f32 %v3538_v38, 0.0 }
 0x251   :  { %v2089_v11 = vadd.f32 %v3256_v51, %v1928_v20  ;;  %v3541_v45 = vadd.f32 %v1740_v46, %v4640_v32  ;;  %v3259_v8 = vadd.f32 %v3258_v16, %v3257_v37  ;;  %v2216_v5 = vmax.f32 %v3539_v6, 0.0 }
 0x252   :  { %v2218_v14 = vmax.f32 %v3540_v21, 0.0  ;;  %v1939_v37 = vadd.f32 %v4552_v57, %v4636_v9 }
 0x253   :  { %v2219_v35 = vmax.f32 %v3541_v45, 0.0  ;;  %v2092_v56 = vadd.f32 %v3259_v8, %v1931_v10  ;;  %v2217_v44 = vmax.f32 %v2089_v11, 0.0 }
 0x254   :  { %v2311_v24 = vpack.c.bf16 %v2218_v14, %v2215_v54 }
 0x255   :  { %v2312_v33 = vpack.c.bf16 %v2219_v35, %v2216_v5  ;;  %v2220_v30 = vmax.f32 %v2092_v56, 0.0  ;;  %v1744_v40 = vpop.f32.mrb[52].mxu0  ;;  %v3260_v1 = vpop.f32.mrb[148].mxu1 }
 0x256   :  { %v3542_v48 = vadd.f32 %v1744_v40, %v4632_v47  ;;  %v1746_v52 = vpop.f32.mrb[53].mxu0  ;;  %v3261_v58 = vpop.f32.mrb[149].mxu1 }
 0x257   :  { %v3543_v18 = vadd.f32 %v1746_v52, %v4640_v32  ;;  %v3262_v38 = vadd.f32 %v3261_v58, %v3260_v1  ;;  %v1748_v41 = vpop.f32.mrb[54].mxu0  ;;  %v3263_v59 = vpop.f32.mrb[150].mxu1  ;;  %2590 = vmatprep.mubr.bf16.mxu0 %v2312_v33  ;;  %v2313_v20 = vpack.c.bf16 %v2220_v30, %v2217_v44  ;;  %v1944_v30 = vadd.f32 %v4561_v55, %v4636_v9 }
 0x258   :  { %v3544_v6 = vadd.f32 %v1748_v41, %v4632_v47  ;;  %v1750_v51 = vpop.f32.mrb[55].mxu0  ;;  %v3264_v17 = vpop.f32.mrb[151].mxu1  ;;  %2591 = vmatmul.mubr.bf16.vlgmr.msra.gmra.mrb[112].mxu0 %v2311_v24  ;;  %v2221_v39 = vmax.f32 %v3542_v48, 0.0  ;;  %v1947_v41 = vadd.f32 %v4563_v62, %v4636_v9 }
 0x259   :  { %v2097_v21 = vadd.f32 %v3262_v38, %v1936_v34  ;;  %v3545_v46 = vadd.f32 %v1750_v51, %v4640_v32  ;;  %v3265_v16 = vadd.f32 %v3264_v17, %v3263_v59  ;;  %3502 = vmatprep.mubr.bf16.mxu1 %v2313_v20  ;;  %v2222_v11 = vmax.f32 %v3543_v18, 0.0 }
 0x25a   :  { %v2224_v10 = vmax.f32 %v3544_v6, 0.0 }
 0x25b   :  { %v2225_v45 = vmax.f32 %v3545_v46, 0.0  ;;  %v2100_v8 = vadd.f32 %v3265_v16, %v1939_v37  ;;  %v2223_v14 = vmax.f32 %v2097_v21, 0.0 }
 0x25c   :  { %v2314_v54 = vpack.c.bf16 %v2224_v10, %v2221_v39 }
 0x25d   :  { %v2315_v5 = vpack.c.bf16 %v2225_v45, %v2222_v11  ;;  %v2226_v35 = vmax.f32 %v2100_v8, 0.0  ;;  %v1754_v56 = vpop.f32.mrb[56].mxu0  ;;  %v3266_v44 = vpop.f32.mrb[152].mxu1 }
 0x25e   :  { %v3546_v24 = vadd.f32 %v1754_v56, %v4632_v47  ;;  %v1756_v33 = vpop.f32.mrb[57].mxu0  ;;  %v3267_v57 = vpop.f32.mrb[153].mxu1 }
 0x25f   :  { %v2316_v40 = vpack.c.bf16 %v2226_v35, %v2223_v14  ;;  %v3547_v1 = vadd.f32 %v1756_v33, %v4640_v32  ;;  %v3268_v48 = vadd.f32 %v3267_v57, %v3266_v44  ;;  %v1758_v52 = vpop.f32.mrb[58].mxu0  ;;  %v3269_v58 = vpop.f32.mrb[154].mxu1  ;;  %2598 = vmatprep.mubr.bf16.mxu0 %v2315_v5  ;;  %v1952_v14 = vadd.f32 %v4569_v63, %v4636_v9 }
 0x260   :  { %v3548_v34 = vadd.f32 %v1758_v52, %v4632_v47  ;;  %v1760_v18 = vpop.f32.mrb[59].mxu0  ;;  %v3270_v38 = vpop.f32.mrb[155].mxu1  ;;  %2599 = vmatmul.mubr.bf16.gmra.mrb[116].mxu0 %v2314_v54  ;;  %v2227_v55 = vmax.f32 %v3546_v24, 0.0 }
 0x261   :  { %v2105_v59 = vadd.f32 %v3268_v48, %v1944_v30  ;;  %v3549_v20 = vadd.f32 %v1760_v18, %v4640_v32  ;;  %v3271_v6 = vadd.f32 %v3270_v38, %v3269_v58  ;;  %3503 = vmatmul.mubr.bf16.vlgmr.msra.gmra.mrb[208].mxu1 %v2316_v40  ;;  %v2228_v17 = vmax.f32 %v3547_v1, 0.0 }
 0x262   :  { %v2230_v51 = vmax.f32 %v3548_v34, 0.0  ;;  %v1955_v40 = vadd.f32 %v4571_v3, %v4636_v9 }
 0x263   :  { %v2231_v37 = vmax.f32 %v3549_v20, 0.0  ;;  %v2108_v21 = vadd.f32 %v3271_v6, %v1947_v41  ;;  %v2229_v16 = vmax.f32 %v2105_v59, 0.0 }
 0x264   :  { %v2317_v46 = vpack.c.bf16 %v2230_v51, %v2227_v55 }
 0x265   :  { %v2318_v39 = vpack.c.bf16 %v2231_v37, %v2228_v17  ;;  %v2232_v10 = vmax.f32 %v2108_v21, 0.0  ;;  %v1764_v11 = vpop.f32.mrb[60].mxu0  ;;  %v3272_v45 = vpop.f32.mrb[156].mxu1  ;;  %v1960_v21 = vadd.f32 %v4577_v60, %v4636_v9 }
 0x266   :  { %v3550_v8 = vadd.f32 %v1764_v11, %v4632_v47  ;;  %v1766_v54 = vpop.f32.mrb[61].mxu0  ;;  %v3273_v62 = vpop.f32.mrb[157].mxu1 }
 0x267   :  { %v3551_v5 = vadd.f32 %v1766_v54, %v4640_v32  ;;  %v3274_v35 = vadd.f32 %v3273_v62, %v3272_v45  ;;  %v1768_v56 = vpop.f32.mrb[62].mxu0  ;;  %v3275_v44 = vpop.f32.mrb[158].mxu1  ;;  %2606 = vmatprep.mubr.bf16.mxu0 %v2318_v39  ;;  %v2319_v24 = vpack.c.bf16 %v2232_v10, %v2229_v16  ;;  %v1963_v62 = vadd.f32 %v4579_v15, %v4636_v9 }
 0x268   :  { %v3552_v33 = vadd.f32 %v1768_v56, %v4632_v47  ;;  %v1770_v57 = vpop.f32.mrb[63].mxu0  ;;  %v3276_v30 = vpop.f32.mrb[159].mxu1  ;;  %2607 = vmatmul.mubr.bf16.gmra.mrb[120].mxu0 %v2317_v46  ;;  %v2233_v63 = vmax.f32 %v3550_v8, 0.0 }
 0x269   :  { %v2113_v1 = vadd.f32 %v3274_v35, %v1952_v14  ;;  %v3553_v48 = vadd.f32 %v1770_v57, %v4640_v32  ;;  %v3277_v52 = vadd.f32 %v3276_v30, %v3275_v44  ;;  %3506 = vmatprep.mubr.bf16.mxu1 %v2319_v24  ;;  %v2234_v34 = vmax.f32 %v3551_v5, 0.0 }
 0x26a   :  { %v2236_v58 = vmax.f32 %v3552_v33, 0.0 }
 0x26b   :  { %v2237_v18 = vmax.f32 %v3553_v48, 0.0  ;;  %v2116_v38 = vadd.f32 %v3277_v52, %v1955_v40  ;;  %v2235_v59 = vmax.f32 %v2113_v1, 0.0 }
 0x26c   :  { %v2320_v41 = vpack.c.bf16 %v2236_v58, %v2233_v63 }
 0x26d   :  { %v2321_v20 = vpack.c.bf16 %v2237_v18, %v2234_v34  ;;  %v2238_v6 = vmax.f32 %v2116_v38, 0.0  ;;  %v1774_v55 = vpop.f32.mrb[64].mxu0  ;;  %v3278_v51 = vpop.f32.mrb[160].mxu1  ;;  %v1968_v34 = vadd.f32 %v4583_v19, %v4636_v9 }
 0x26e   :  { %v3554_v17 = vadd.f32 %v1774_v55, %v4632_v47  ;;  %v1776_v37 = vpop.f32.mrb[65].mxu0  ;;  %v3279_v3 = vpop.f32.mrb[161].mxu1 }
 0x26f   :  { %v3555_v46 = vadd.f32 %v1776_v37, %v4640_v32  ;;  %v3280_v16 = vadd.f32 %v3279_v3, %v3278_v51  ;;  %v1778_v39 = vpop.f32.mrb[66].mxu0  ;;  %v3281_v10 = vpop.f32.mrb[162].mxu1  ;;  %2614 = vmatprep.mubr.bf16.mxu0 %v2321_v20  ;;  %v2322_v11 = vpack.c.bf16 %v2238_v6, %v2235_v59 }
 0x270   :  { %v3556_v45 = vadd.f32 %v1778_v39, %v4632_v47  ;;  %v1780_v8 = vpop.f32.mrb[67].mxu0  ;;  %v3282_v54 = vpop.f32.mrb[163].mxu1  ;;  %2615 = vmatmul.mubr.bf16.gmra.mrb[124].mxu0 %v2320_v41  ;;  %v2239_v60 = vmax.f32 %v3554_v17, 0.0  ;;  %v1971_v17 = vadd.f32 %v4585_v0, %v4636_v9 }
 0x271   :  { %v2121_v14 = vadd.f32 %v3280_v16, %v1960_v21  ;;  %v3557_v5 = vadd.f32 %v1780_v8, %v4640_v32  ;;  %v3283_v35 = vadd.f32 %v3282_v54, %v3281_v10  ;;  %3507 = vmatmul.mubr.bf16.gmra.mrb[212].mxu1 %v2322_v11  ;;  %v2240_v44 = vmax.f32 %v3555_v46, 0.0 }
 0x272   :  { %v2242_v56 = vmax.f32 %v3556_v45, 0.0 }
 0x273   :  { %v2243_v24 = vmax.f32 %v3557_v5, 0.0  ;;  %v2124_v33 = vadd.f32 %v3283_v35, %v1963_v62  ;;  %v2241_v30 = vmax.f32 %v2121_v14, 0.0 }
 0x274   :  { %v2323_v57 = vpack.c.bf16 %v2242_v56, %v2239_v60  ;;  %v1976_v60 = vadd.f32 %v4587_v28, %v4636_v9 }
 0x275   :  { %v2324_v40 = vpack.c.bf16 %v2243_v24, %v2240_v44  ;;  %v2244_v1 = vmax.f32 %v2124_v33, 0.0  ;;  %v1784_v48 = vpop.f32.mrb[68].mxu0  ;;  %v3284_v52 = vpop.f32.mrb[164].mxu1 }
 0x276   :  { %v3558_v63 = vadd.f32 %v1784_v48, %v4632_v47  ;;  %v1786_v58 = vpop.f32.mrb[69].mxu0  ;;  %v3285_v15 = vpop.f32.mrb[165].mxu1  ;;  %v1979_v48 = vadd.f32 %v4589_v29, %v4636_v9 }
 0x277   :  { %v3559_v18 = vadd.f32 %v1786_v58, %v4640_v32  ;;  %v3286_v38 = vadd.f32 %v3285_v15, %v3284_v52  ;;  %v1788_v41 = vpop.f32.mrb[70].mxu0  ;;  %v3287_v59 = vpop.f32.mrb[166].mxu1  ;;  %2622 = vmatprep.mubr.bf16.mxu0 %v2324_v40  ;;  %v2325_v20 = vpack.c.bf16 %v2244_v1, %v2241_v30 }
 0x278   :  { %v3560_v6 = vadd.f32 %v1788_v41, %v4632_v47  ;;  %v1790_v55 = vpop.f32.mrb[71].mxu0  ;;  %v3288_v51 = vpop.f32.mrb[167].mxu1  ;;  %2623 = vmatmul.mubr.bf16.gmra.mrb[128].mxu0 %v2323_v57  ;;  %v2245_v19 = vmax.f32 %v3558_v63, 0.0 }
 0x279   :  { %v2129_v37 = vadd.f32 %v3286_v38, %v1968_v34  ;;  %v3561_v3 = vadd.f32 %v1790_v55, %v4640_v32  ;;  %v3289_v21 = vadd.f32 %v3288_v51, %v3287_v59  ;;  %3510 = vmatprep.mubr.bf16.mxu1 %v2325_v20  ;;  %v2246_v16 = vmax.f32 %v3559_v18, 0.0 }
 0x27a   :  { %v2248_v46 = vmax.f32 %v3560_v6, 0.0 }
 0x27b   :  { %v2249_v39 = vmax.f32 %v3561_v3, 0.0  ;;  %v2132_v10 = vadd.f32 %v3289_v21, %v1971_v17  ;;  %v2247_v45 = vmax.f32 %v2129_v37, 0.0  ;;  %v1984_v3 = vadd.f32 %v4591_v49, %v4636_v9 }
 0x27c   :  { %v2326_v11 = vpack.c.bf16 %v2248_v46, %v2245_v19 }
 0x27d   :  { %v2327_v8 = vpack.c.bf16 %v2249_v39, %v2246_v16  ;;  %v2250_v54 = vmax.f32 %v2132_v10, 0.0  ;;  %v1794_v62 = vpop.f32.mrb[72].mxu0  ;;  %v3290_v14 = vpop.f32.mrb[168].mxu1 }
 0x27e   :  { %v3562_v5 = vadd.f32 %v1794_v62, %v4632_v47  ;;  %v1796_v35 = vpop.f32.mrb[73].mxu0  ;;  %v3291_v0 = vpop.f32.mrb[169].mxu1 }
 0x27f   :  { %v3563_v56 = vadd.f32 %v1796_v35, %v4640_v32  ;;  %v3292_v44 = vadd.f32 %v3291_v0, %v3290_v14  ;;  %v1798_v24 = vpop.f32.mrb[74].mxu0  ;;  %v3293_v33 = vpop.f32.mrb[170].mxu1  ;;  %2630 = vmatprep.mubr.bf16.mxu0 %v2327_v8  ;;  %v2328_v57 = vpack.c.bf16 %v2250_v54, %v2247_v45  ;;  %v1987_v8 = vadd.f32 %v4593_v23, %v4636_v9 }
 0x280   :  { %v3564_v30 = vadd.f32 %v1798_v24, %v4632_v47  ;;  %v1800_v40 = vpop.f32.mrb[75].mxu0  ;;  %v3294_v1 = vpop.f32.mrb[171].mxu1  ;;  %2631 = vmatmul.mubr.bf16.gmra.mrb[132].mxu0 %v2326_v11  ;;  %v2251_v28 = vmax.f32 %v3562_v5, 0.0 }
 0x281   :  { %v2137_v52 = vadd.f32 %v3292_v44, %v1976_v60  ;;  %v3565_v63 = vadd.f32 %v1800_v40, %v4640_v32  ;;  %v3295_v58 = vadd.f32 %v3294_v1, %v3293_v33  ;;  %3511 = vmatmul.mubr.bf16.gmra.mrb[216].mxu1 %v2328_v57  ;;  %v2252_v34 = vmax.f32 %v3563_v56, 0.0 }
 0x282   :  { %v2254_v15 = vmax.f32 %v3564_v30, 0.0 }
 0x283   :  { %v2255_v18 = vmax.f32 %v3565_v63, 0.0  ;;  %v2140_v38 = vadd.f32 %v3295_v58, %v1979_v48  ;;  %v2253_v59 = vmax.f32 %v2137_v52, 0.0  ;;  %v1992_v48 = vadd.f32 %v4595_v4, %v4636_v9 }
 0x284   :  { %v2329_v41 = vpack.c.bf16 %v2254_v15, %v2251_v28 }
 0x285   :  { %v2330_v20 = vpack.c.bf16 %v2255_v18, %v2252_v34  ;;  %v2256_v6 = vmax.f32 %v2140_v38, 0.0  ;;  %v1804_v55 = vpop.f32.mrb[76].mxu0  ;;  %v3296_v51 = vpop.f32.mrb[172].mxu1 }
 0x286   :  { %v3566_v17 = vadd.f32 %v1804_v55, %v4632_v47  ;;  %v1806_v37 = vpop.f32.mrb[77].mxu0  ;;  %v3297_v29 = vpop.f32.mrb[173].mxu1 }
 0x287   :  { %v3567_v21 = vadd.f32 %v1806_v37, %v4640_v32  ;;  %v3298_v19 = vadd.f32 %v3297_v29, %v3296_v51  ;;  %v1808_v46 = vpop.f32.mrb[78].mxu0  ;;  %v3299_v16 = vpop.f32.mrb[174].mxu1  ;;  %2638 = vmatprep.mubr.bf16.mxu0 %v2330_v20  ;;  %v2331_v39 = vpack.c.bf16 %v2256_v6, %v2253_v59 }
 0x288   :  { %v3568_v10 = vadd.f32 %v1808_v46, %v4632_v47  ;;  %v1810_v11 = vpop.f32.mrb[79].mxu0  ;;  %v3300_v45 = vpop.f32.mrb[175].mxu1  ;;  %2639 = vmatmul.mubr.bf16.gmra.mrb[136].mxu0 %v2329_v41  ;;  %v2257_v49 = vmax.f32 %v3566_v17, 0.0  ;;  %v1995_v41 = vadd.f32 %v4597_v25, %v4636_v9 }
 0x289   :  { %v2145_v54 = vadd.f32 %v3298_v19, %v1984_v3  ;;  %v3569_v62 = vadd.f32 %v1810_v11, %v4640_v32  ;;  %v3301_v14 = vadd.f32 %v3300_v45, %v3299_v16  ;;  %3514 = vmatprep.mubr.bf16.mxu1 %v2331_v39  ;;  %v2258_v35 = vmax.f32 %v3567_v21, 0.0 }
 0x28a   :  { %v2260_v5 = vmax.f32 %v3568_v10, 0.0  ;;  %v2000_v11 = vadd.f32 %v4599_v50, %v4636_v9 }
 0x28b   :  { %v2261_v0 = vmax.f32 %v3569_v62, 0.0  ;;  %v2148_v60 = vadd.f32 %v3301_v14, %v1987_v8  ;;  %v2259_v44 = vmax.f32 %v2145_v54, 0.0 }
 0x28c   :  { %v2332_v56 = vpack.c.bf16 %v2260_v5, %v2257_v49 }
 0x28d   :  { %v2333_v24 = vpack.c.bf16 %v2261_v0, %v2258_v35  ;;  %v2262_v33 = vmax.f32 %v2148_v60, 0.0  ;;  %v1814_v57 = vpop.f32.mrb[80].mxu0  ;;  %v3302_v30 = vpop.f32.mrb[176].mxu1  ;;  %v2003_v0 = vadd.f32 %v4601_v12, %v4636_v9 }
 0x28e   :  { %v3570_v40 = vadd.f32 %v1814_v57, %v4632_v47  ;;  %v1816_v1 = vpop.f32.mrb[81].mxu0  ;;  %v3303_v23 = vpop.f32.mrb[177].mxu1 }
 0x28f   :  { %v3571_v52 = vadd.f32 %v1816_v1, %v4640_v32  ;;  %v3304_v63 = vadd.f32 %v3303_v23, %v3302_v30  ;;  %v1818_v58 = vpop.f32.mrb[82].mxu0  ;;  %v3305_v28 = vpop.f32.mrb[178].mxu1  ;;  %2646 = vmatprep.mubr.bf16.mxu0 %v2333_v24  ;;  %v2334_v15 = vpack.c.bf16 %v2262_v33, %v2259_v44 }
 0x290   :  { %v3572_v34 = vadd.f32 %v1818_v58, %v4632_v47  ;;  %v1820_v18 = vpop.f32.mrb[83].mxu0  ;;  %v3306_v38 = vpop.f32.mrb[179].mxu1  ;;  %2647 = vmatmul.mubr.bf16.gmra.mrb[140].mxu0 %v2332_v56  ;;  %v2263_v4 = vmax.f32 %v3570_v40, 0.0 }
 0x291   :  { %v2153_v59 = vadd.f32 %v3304_v63, %v1992_v48  ;;  %v3573_v20 = vadd.f32 %v1820_v18, %v4640_v32  ;;  %v3307_v6 = vadd.f32 %v3306_v38, %v3305_v28  ;;  %3515 = vmatmul.mubr.bf16.gmra.mrb[220].mxu1 %v2334_v15  ;;  %v2264_v51 = vmax.f32 %v3571_v52, 0.0 }
 0x292   :  { %v2266_v55 = vmax.f32 %v3572_v34, 0.0  ;;  %v2008_v15 = vadd.f32 %v4603_v36, %v4636_v9 }
 0x293   :  { %v2267_v17 = vmax.f32 %v3573_v20, 0.0  ;;  %v2156_v37 = vadd.f32 %v3307_v6, %v1995_v41  ;;  %v2265_v3 = vmax.f32 %v2153_v59, 0.0 }
 0x294   :  { %v2335_v29 = vpack.c.bf16 %v2266_v55, %v2263_v4  ;;  %v2011_v55 = vadd.f32 %v4605_v42, %v4636_v9 }
 0x295   :  { %v2336_v21 = vpack.c.bf16 %v2267_v17, %v2264_v51  ;;  %v2268_v19 = vmax.f32 %v2156_v37, 0.0  ;;  %v1824_v46 = vpop.f32.mrb[84].mxu0  ;;  %v3308_v16 = vpop.f32.mrb[180].mxu1 }
 0x296   :  { %v3574_v39 = vadd.f32 %v1824_v46, %v4632_v47  ;;  %v1826_v10 = vpop.f32.mrb[85].mxu0  ;;  %v3309_v25 = vpop.f32.mrb[181].mxu1 }
 0x297   :  { %v3575_v45 = vadd.f32 %v1826_v10, %v4640_v32  ;;  %v3310_v8 = vadd.f32 %v3309_v25, %v3308_v16  ;;  %v1828_v54 = vpop.f32.mrb[86].mxu0  ;;  %v3311_v62 = vpop.f32.mrb[182].mxu1  ;;  %2654 = vmatprep.mubr.bf16.mxu0 %v2336_v21  ;;  %v2337_v14 = vpack.c.bf16 %v2268_v19, %v2265_v3 }
 0x298   :  { %v3576_v49 = vadd.f32 %v1828_v54, %v4632_v47  ;;  %v1830_v5 = vpop.f32.mrb[87].mxu0  ;;  %v3312_v35 = vpop.f32.mrb[183].mxu1  ;;  %2655 = vmatmul.mubr.bf16.gmra.mrb[144].mxu0 %v2335_v29  ;;  %v2269_v50 = vmax.f32 %v3574_v39, 0.0  ;;  %v2016_v54 = vadd.f32 %v4607_v7, %v4636_v9 }
 0x299   :  { %v2161_v60 = vadd.f32 %v3310_v8, %v2000_v11  ;;  %v3577_v56 = vadd.f32 %v1830_v5, %v4640_v32  ;;  %v3313_v44 = vadd.f32 %v3312_v35, %v3311_v62  ;;  %3518 = vmatprep.mubr.bf16.mxu1 %v2337_v14  ;;  %v2270_v33 = vmax.f32 %v3575_v45, 0.0 }
 0x29a   :  { %v2272_v24 = vmax.f32 %v3576_v49, 0.0 }
 0x29b   :  { %v2273_v57 = vmax.f32 %v3577_v56, 0.0  ;;  %v2164_v30 = vadd.f32 %v3313_v44, %v2003_v0  ;;  %v2271_v1 = vmax.f32 %v2161_v60, 0.0  ;;  %v2019_v44 = vadd.f32 %v4609_v61, %v4636_v9 }
 0x29c   :  { %v2338_v40 = vpack.c.bf16 %v2272_v24, %v2269_v50 }
 0x29d   :  { %v2339_v23 = vpack.c.bf16 %v2273_v57, %v2270_v33  ;;  %v2274_v48 = vmax.f32 %v2164_v30, 0.0  ;;  %v1834_v52 = vpop.f32.mrb[88].mxu0  ;;  %v3314_v63 = vpop.f32.mrb[184].mxu1 }
 0x29e   :  { %v3578_v58 = vadd.f32 %v1834_v52, %v4632_v47  ;;  %v1836_v28 = vpop.f32.mrb[89].mxu0  ;;  %v3315_v12 = vpop.f32.mrb[185].mxu1 }
 0x29f   :  { %v3579_v34 = vadd.f32 %v1836_v28, %v4640_v32  ;;  %v3316_v18 = vadd.f32 %v3315_v12, %v3314_v63  ;;  %v1838_v38 = vpop.f32.mrb[90].mxu0  ;;  %v3317_v41 = vpop.f32.mrb[186].mxu1  ;;  %2662 = vmatprep.mubr.bf16.mxu0 %v2339_v23  ;;  %v2340_v59 = vpack.c.bf16 %v2274_v48, %v2271_v1 }
 0x2a0   :  { %v3580_v20 = vadd.f32 %v1838_v38, %v4632_v47  ;;  %v1840_v6 = vpop.f32.mrb[91].mxu0  ;;  %v3318_v4 = vpop.f32.mrb[187].mxu1  ;;  %2663 = vmatmul.mubr.bf16.gmra.mrb[148].mxu0 %v2338_v40  ;;  %v2275_v36 = vmax.f32 %v3578_v58, 0.0 }
 0x2a1   :  { %v2169_v51 = vadd.f32 %v3316_v18, %v2008_v15  ;;  %v3581_v17 = vadd.f32 %v1840_v6, %v4640_v32  ;;  %v3319_v37 = vadd.f32 %v3318_v4, %v3317_v41  ;;  %3519 = vmatmul.mubr.bf16.gmra.mrb[224].mxu1 %v2340_v59  ;;  %v2276_v3 = vmax.f32 %v3579_v34, 0.0 }
 0x2a2   :  { %v2278_v29 = vmax.f32 %v3580_v20, 0.0  ;;  %v2024_v34 = vadd.f32 %v4611_v2, %v4636_v9 }
 0x2a3   :  { %v2279_v21 = vmax.f32 %v3581_v17, 0.0  ;;  %v2172_v19 = vadd.f32 %v3319_v37, %v2011_v55  ;;  %v2277_v16 = vmax.f32 %v2169_v51, 0.0  ;;  %v2027_v51 = vadd.f32 %v4613_v53, %v4636_v9 }
 0x2a4   :  { %v2341_v46 = vpack.c.bf16 %v2278_v29, %v2275_v36 }
 0x2a5   :  { %v2342_v39 = vpack.c.bf16 %v2279_v21, %v2276_v3  ;;  %v2280_v10 = vmax.f32 %v2172_v19, 0.0  ;;  %v1844_v25 = vpop.f32.mrb[92].mxu0  ;;  %v3320_v11 = vpop.f32.mrb[188].mxu1 }
 0x2a6   :  { %v3582_v45 = vadd.f32 %v1844_v25, %v4632_v47  ;;  %v1846_v8 = vpop.f32.mrb[93].mxu0  ;;  %v3321_v42 = vpop.f32.mrb[189].mxu1 }
 0x2a7   :  { %v3583_v62 = vadd.f32 %v1846_v8, %v4640_v32  ;;  %v3322_v14 = vadd.f32 %v3321_v42, %v3320_v11  ;;  %v1848_v49 = vpop.f32.mrb[94].mxu0  ;;  %v3323_v5 = vpop.f32.mrb[190].mxu1  ;;  %2670 = vmatprep.mubr.bf16.mxu0 %v2342_v39  ;;  %v2343_v35 = vpack.c.bf16 %v2280_v10, %v2277_v16  ;;  %v2032_v42 = vadd.f32 %v4615_v13, %v4636_v9 }
 0x2a8   :  { %v3584_v0 = vadd.f32 %v1848_v49, %v4632_v47  ;;  %v1850_v60 = vpop.f32.mrb[95].mxu0  ;;  %v3324_v56 = vpop.f32.mrb[191].mxu1  ;;  %2671 = vmatmul.mubr.bf16.gmra.mrb[152].mxu0 %v2341_v46  ;;  %v2281_v7 = vmax.f32 %v3582_v45, 0.0 }
 0x2a9   :  { %v2177_v50 = vadd.f32 %v3322_v14, %v2016_v54  ;;  %v3585_v24 = vadd.f32 %v1850_v60, %v4640_v32  ;;  %v3325_v33 = vadd.f32 %v3324_v56, %v3323_v5  ;;  %3522 = vmatprep.mubr.bf16.mxu1 %v2343_v35  ;;  %v2282_v30 = vmax.f32 %v3583_v62, 0.0 }
 0x2aa   :  { %v2284_v57 = vmax.f32 %v3584_v0, 0.0  ;;  %v2035_v56 = vadd.f32 %v4617_v22, %v4636_v9 }
 0x2ab   :  { %v2285_v40 = vmax.f32 %v3585_v24, 0.0  ;;  %v2180_v1 = vadd.f32 %v3325_v33, %v2019_v44  ;;  %v2283_v48 = vmax.f32 %v2177_v50, 0.0 }
 0x2ac   :  { %v2344_v23 = vpack.c.bf16 %v2284_v57, %v2281_v7 }
 0x2ad   :  { %v2345_v52 = vpack.c.bf16 %v2285_v40, %v2282_v30  ;;  %v2286_v63 = vmax.f32 %v2180_v1, 0.0  ;;  %v1854_v58 = vpop.f32.mrb[96].mxu0  ;;  %v3326_v28 = vpop.f32.mrb[192].mxu1 }
 0x2ae   :  { %v3586_v12 = vadd.f32 %v1854_v58, %v4632_v47  ;;  %v1856_v15 = vpop.f32.mrb[97].mxu0  ;;  %v3327_v61 = vpop.f32.mrb[193].mxu1 }
 0x2af   :  { %v3587_v18 = vadd.f32 %v1856_v15, %v4640_v32  ;;  %v3328_v38 = vadd.f32 %v3327_v61, %v3326_v28  ;;  %v1858_v41 = vpop.f32.mrb[98].mxu0  ;;  %v3329_v59 = vpop.f32.mrb[194].mxu1  ;;  %2678 = vmatprep.mubr.bf16.mxu0 %v2345_v52  ;;  %v2346_v20 = vpack.c.bf16 %v2286_v63, %v2283_v48 }
 0x2b0   :  { %v3588_v6 = vadd.f32 %v1858_v41, %v4632_v47  ;;  %v1860_v4 = vpop.f32.mrb[99].mxu0  ;;  %v3330_v55 = vpop.f32.mrb[195].mxu1  ;;  %2679 = vmatmul.mubr.bf16.gmra.mrb[156].mxu0 %v2344_v23  ;;  %v2287_v2 = vmax.f32 %v3586_v12, 0.0  ;;  %v2040_v12 = vadd.f32 %v4619_v31, %v4636_v9 }
 0x2b1   :  { %v2185_v17 = vadd.f32 %v3328_v38, %v2024_v34  ;;  %v3589_v37 = vadd.f32 %v1860_v4, %v4640_v32  ;;  %v3331_v36 = vadd.f32 %v3330_v55, %v3329_v59  ;;  %3523 = vmatmul.mubr.bf16.gmra.mrb[228].mxu1 %v2346_v20  ;;  %v2288_v3 = vmax.f32 %v3587_v18, 0.0 }
 0x2b2   :  { %v2290_v29 = vmax.f32 %v3588_v6, 0.0  ;;  %v2043_v6 = vadd.f32 %v4621_v43, %v4636_v9 }
 0x2b3   :  { %v2291_v21 = vmax.f32 %v3589_v37, 0.0  ;;  %v2188_v19 = vadd.f32 %v3331_v36, %v2027_v51  ;;  %v2289_v16 = vmax.f32 %v2185_v17, 0.0 }
 0x2b4   :  { %v2347_v46 = vpack.c.bf16 %v2290_v29, %v2287_v2 }
 0x2b5   :  { %v2348_v39 = vpack.c.bf16 %v2291_v21, %v2288_v3  ;;  %v2292_v10 = vmax.f32 %v2188_v19, 0.0  ;;  %v1864_v25 = vpop.f32.mrb[100].mxu0  ;;  %v3332_v11 = vpop.f32.mrb[196].mxu1 }
 0x2b6   :  { %v3590_v45 = vadd.f32 %v1864_v25, %v4632_v47  ;;  %v1866_v8 = vpop.f32.mrb[101].mxu0  ;;  %v3333_v53 = vpop.f32.mrb[197].mxu1  ;;  %v2048_v25 = vadd.f32 %v4623_v26, %v4636_v9 }
 0x2b7   :  { %v3591_v54 = vadd.f32 %v1866_v8, %v4640_v32  ;;  %v3334_v62 = vadd.f32 %v3333_v53, %v3332_v11  ;;  %v1868_v14 = vpop.f32.mrb[102].mxu0  ;;  %v3335_v49 = vpop.f32.mrb[198].mxu1  ;;  %2686 = vmatprep.mubr.bf16.mxu0 %v2348_v39  ;;  %v2349_v5 = vpack.c.bf16 %v2292_v10, %v2289_v16 }
 0x2b8   :  { %v3592_v35 = vadd.f32 %v1868_v14, %v4632_v47  ;;  %v1870_v0 = vpop.f32.mrb[103].mxu0  ;;  %v3336_v60 = vpop.f32.mrb[199].mxu1  ;;  %2687 = vmatmul.mubr.bf16.gmra.mrb[160].mxu0 %v2347_v46  ;;  %v2293_v13 = vmax.f32 %v3590_v45, 0.0 }
 0x2b9   :  { %v2193_v44 = vadd.f32 %v3334_v62, %v2032_v42  ;;  %v3593_v50 = vadd.f32 %v1870_v0, %v4640_v32  ;;  %v3337_v24 = vadd.f32 %v3336_v60, %v3335_v49  ;;  %3526 = vmatprep.mubr.bf16.mxu1 %v2349_v5  ;;  %v2294_v7 = vmax.f32 %v3591_v54, 0.0 }
 0x2ba   :  { %v2296_v33 = vmax.f32 %v3592_v35, 0.0  ;;  %v2051_v49 = vadd.f32 %v4628_v27, %v4636_v9 }
 0x2bb   :  { %v2297_v57 = vmax.f32 %v3593_v50, 0.0  ;;  %v2196_v30 = vadd.f32 %v3337_v24, %v2035_v56  ;;  %v2295_v1 = vmax.f32 %v2193_v44, 0.0 }
 0x2bc   :  { %v2350_v40 = vpack.c.bf16 %v2296_v33, %v2293_v13 }
 0x2bd   :  { %v2351_v23 = vpack.c.bf16 %v2297_v57, %v2294_v7  ;;  %v2298_v48 = vmax.f32 %v2196_v30, 0.0  ;;  %v1874_v52 = vpop.f32.mrb[104].mxu0  ;;  %v3338_v63 = vpop.f32.mrb[200].mxu1 }
 0x2be   :  { %v3594_v58 = vadd.f32 %v1874_v52, %v4632_v47  ;;  %v1876_v28 = vpop.f32.mrb[105].mxu0  ;;  %v3339_v22 = vpop.f32.mrb[201].mxu1 }
 0x2bf   :  { %v3595_v15 = vadd.f32 %v1876_v28, %v4640_v32  ;;  %v3340_v61 = vadd.f32 %v3339_v22, %v3338_v63  ;;  %v1878_v34 = vpop.f32.mrb[106].mxu0  ;;  %v3341_v18 = vpop.f32.mrb[202].mxu1  ;;  %2694 = vmatprep.mubr.bf16.mxu0 %v2351_v23  ;;  %v2352_v38 = vpack.c.bf16 %v2298_v48, %v2295_v1  ;;  %v4773_v1 = vld [vmem:[%s4909_s6] ss:$0 sm:$0xff] }
 0x2c0   :  { %v3596_v41 = vadd.f32 %v1878_v34, %v4632_v47  ;;  %v1880_v59 = vpop.f32.mrb[107].mxu0  ;;  %v3342_v20 = vpop.f32.mrb[203].mxu1  ;;  %2695 = vmatmul.mubr.bf16.gmra.mrb[164].mxu0 %v2350_v40  ;;  %v2299_v31 = vmax.f32 %v3594_v58, 0.0 }
 0x2c1   :  { %v2201_v4 = vadd.f32 %v3340_v61, %v2040_v12  ;;  %v3597_v55 = vadd.f32 %v1880_v59, %v4640_v32  ;;  %v3343_v51 = vadd.f32 %v3342_v20, %v3341_v18  ;;  %3527 = vmatmul.mubr.bf16.gmra.mrb[232].mxu1 %v2352_v38  ;;  %v2300_v37 = vmax.f32 %v3595_v15, 0.0 }
 0x2c2   :  { %v2302_v17 = vmax.f32 %v3596_v41, 0.0 }
 0x2c3   :  { %v2303_v36 = vmax.f32 %v3597_v55, 0.0  ;;  %v2204_v2 = vadd.f32 %v3343_v51, %v2043_v6  ;;  %v2301_v3 = vmax.f32 %v2201_v4, 0.0 }
 0x2c4   :  { %v2353_v29 = vpack.c.bf16 %v2302_v17, %v2299_v31 }
 0x2c5   :  { %v2354_v21 = vpack.c.bf16 %v2303_v36, %v2300_v37  ;;  %v2304_v19 = vmax.f32 %v2204_v2, 0.0  ;;  %v1884_v46 = vpop.f32.mrb[108].mxu0  ;;  %v3344_v16 = vpop.f32.mrb[204].mxu1 }
 0x2c6   :  { %v3598_v39 = vadd.f32 %v1884_v46, %v4632_v47  ;;  %v1886_v10 = vpop.f32.mrb[109].mxu0  ;;  %v3345_v43 = vpop.f32.mrb[205].mxu1 }
 0x2c7   :  { %v3599_v11 = vadd.f32 %v1886_v10, %v4640_v32  ;;  %v3346_v45 = vadd.f32 %v3345_v43, %v3344_v16  ;;  %v1888_v8 = vpop.f32.mrb[110].mxu0  ;;  %v3347_v53 = vpop.f32.mrb[206].mxu1  ;;  %2702 = vmatprep.mubr.bf16.mxu0 %v2354_v21  ;;  %v2355_v42 = vpack.c.bf16 %v2304_v19, %v2301_v3 }
 0x2c8   :  { %v3600_v54 = vadd.f32 %v1888_v8, %v4632_v47  ;;  %v1890_v62 = vpop.f32.mrb[111].mxu0  ;;  %v3348_v14 = vpop.f32.mrb[207].mxu1  ;;  %2703 = vmatmul.mubr.bf16.gmra.mrb[168].mxu0 %v2353_v29  ;;  %v2305_v26 = vmax.f32 %v3598_v39, 0.0 }
 0x2c9   :  { %v2209_v5 = vadd.f32 %v3346_v45, %v2048_v25  ;;  %v3601_v35 = vadd.f32 %v1890_v62, %v4640_v32  ;;  %v3349_v0 = vadd.f32 %v3348_v14, %v3347_v53  ;;  %3530 = vmatprep.mubr.bf16.mxu1 %v2355_v42  ;;  %v2306_v56 = vmax.f32 %v3599_v11, 0.0 }
 0x2ca   :  { %v2308_v60 = vmax.f32 %v3600_v54, 0.0 }
 0x2cb   :  { %v2309_v44 = vmax.f32 %v3601_v35, 0.0  ;;  %v2212_v50 = vadd.f32 %v3349_v0, %v2051_v49  ;;  %v2307_v13 = vmax.f32 %v2209_v5, 0.0 }
 0x2cc   :  { %v2356_v24 = vpack.c.bf16 %v2308_v60, %v2305_v26 }
 0x2cd   :  { %v2357_v33 = vpack.c.bf16 %v2309_v44, %v2306_v56  ;;  %v2310_v47 = vmax.f32 %v2212_v50, 0.0 }
 0x2cf   :  { %2710 = vmatprep.mubr.bf16.mxu0 %v2357_v33  ;;  %v2358_v7 = vpack.c.bf16 %v2310_v47, %v2307_v13 }
 0x2d0   :  { %2711 = vmatmul.mubr.bf16.gmra.mrb[172].mxu0 %v2356_v24 }
 0x2d1   :  { %3531 = vmatmul.mubr.bf16.gmra.mrb[236].mxu1 %v2358_v7 }
 0x32b   :  { %v3366_v57 = vpop.f32.mrb[112].mxu0 }
 0x32c   :  { %v3367_v27 = vpop.f32.mrb[113].mxu0 }
 0x32d   :  { %v3368_v9 = vadd.f32 %v3367_v27, %v3366_v57  ;;  %v3369_v30 = vpop.f32.mrb[114].mxu0 }
 0x32e   :  { %v3370_v32 = vpop.f32.mrb[115].mxu0 }
 0x32f   :  { %v3371_v40 = vadd.f32 %v3370_v32, %v3369_v30  ;;  %v2593_v63 = vadd.f32 %v3368_v9, %v4773_v1 }
 0x331   :  { %v2596_v34 = vadd.f32 %v3371_v40, %v4773_v1 }
 0x333   :  { %v3372_v23 = vpop.f32.mrb[116].mxu0 }
 0x334   :  { %v3373_v48 = vpop.f32.mrb[117].mxu0  ;;  %v3504_v52 = vpop.f32.mrb[208].mxu1 }
 0x335   :  { %v3374_v58 = vadd.f32 %v3373_v48, %v3372_v23  ;;  %v3375_v28 = vpop.f32.mrb[118].mxu0  ;;  %v2753_v22 = vpop.f32.mrb[209].mxu1 }
 0x336   :  { %v2754_v12 = vadd.f32 %v2753_v22, %v2593_v63  ;;  %v3376_v15 = vpop.f32.mrb[119].mxu0  ;;  %v3505_v61 = vpop.f32.mrb[210].mxu1 }
 0x337   :  { %v2601_v18 = vadd.f32 %v3374_v58, %v4773_v1  ;;  %v3377_v38 = vadd.f32 %v3376_v15, %v3375_v28  ;;  %v2756_v41 = vpop.f32.mrb[211].mxu1 }
 0x338   :  { %3850 = vtanh.f32 %v2754_v12  ;;  %v2757_v59 = vadd.f32 %v2756_v41, %v2596_v34 }
 0x339   :  { %v2762_v20 = vadd.f32 %v3504_v52, %v2601_v18  ;;  %v2604_v6 = vadd.f32 %v3377_v38, %v4773_v1 }
 0x33a   :  { %3852 = vtanh.f32 %v2757_v59 }
 0x33b   :  { %3854 = vtanh.f32 %v2762_v20  ;;  %v2765_v4 = vadd.f32 %v3505_v61, %v2604_v6  ;;  %v3378_v55 = vpop.f32.mrb[120].mxu0 }
 0x33c   :  { %v3379_v51 = vpop.f32.mrb[121].mxu0 }
 0x33d   :  { %3856 = vtanh.f32 %v2765_v4  ;;  %v3380_v31 = vadd.f32 %v3379_v51, %v3378_v55  ;;  %v3381_v17 = vpop.f32.mrb[122].mxu0 }
 0x33e   :  { %v3382_v37 = vpop.f32.mrb[123].mxu0 }
 0x33f   :  { %v3383_v36 = vadd.f32 %v3382_v37, %v3381_v17  ;;  %v2609_v46 = vadd.f32 %v3380_v31, %v4773_v1 }
 0x341   :  { %v2612_v8 = vadd.f32 %v3383_v36, %v4773_v1 }
 0x342   :  { %v3851_v2 = vpop.eup %3850 }
 0x343   :  { %2912 = vst [vmem:[%s4910_s7] sm:$0xff] %v3851_v2  ;;  %v3384_v29 = vpop.f32.mrb[124].mxu0 }
 0x344   :  { %v3853_v3 = vpop.eup %3852  ;;  %v3385_v21 = vpop.f32.mrb[125].mxu0 }
 0x345   :  { %v3508_v19 = vpop.f32.mrb[212].mxu1  ;;  %v3855_v16 = vpop.eup %3854  ;;  %2913 = vst [vmem:[%s4910_s7 + $0x8] sm:$0xff] %v3853_v3  ;;  %v3386_v39 = vadd.f32 %v3385_v21, %v3384_v29 }
 0x346   :  { %v3387_v10 = vpop.f32.mrb[126].mxu0  ;;  %v2769_v43 = vpop.f32.mrb[213].mxu1  ;;  %2914 = vst [vmem:[%s4910_s7 + $0x10] sm:$0xff] %v3855_v16 }
 0x347   :  { %v2770_v25 = vadd.f32 %v2769_v43, %v2609_v46  ;;  %v3388_v11 = vpop.f32.mrb[127].mxu0  ;;  %v3509_v45 = vpop.f32.mrb[214].mxu1  ;;  %v2617_v42 = vadd.f32 %v3386_v39, %v4773_v1 }
 0x348   :  { %v3857_v53 = vpop.eup %3856  ;;  %v3389_v54 = vadd.f32 %v3388_v11, %v3387_v10  ;;  %v2772_v62 = vpop.f32.mrb[215].mxu1 }
 0x349   :  { %2915 = vst [vmem:[%s4910_s7 + $0x18] sm:$0xff] %v3857_v53  ;;  %3858 = vtanh.f32 %v2770_v25  ;;  %v2773_v14 = vadd.f32 %v2772_v62, %v2612_v8  ;;  %v2778_v49 = vadd.f32 %v3508_v19, %v2617_v42 }
 0x34a   :  { %v2620_v5 = vadd.f32 %v3389_v54, %v4773_v1 }
 0x34b   :  { %3860 = vtanh.f32 %v2773_v14  ;;  %v3390_v0 = vpop.f32.mrb[128].mxu0 }
 0x34c   :  { %3862 = vtanh.f32 %v2778_v49  ;;  %v2781_v35 = vadd.f32 %v3509_v45, %v2620_v5  ;;  %v3391_v26 = vpop.f32.mrb[129].mxu0 }
 0x34d   :  { %v3392_v60 = vadd.f32 %v3391_v26, %v3390_v0  ;;  %v3393_v56 = vpop.f32.mrb[130].mxu0 }
 0x34e   :  { %3864 = vtanh.f32 %v2781_v35  ;;  %v3394_v44 = vpop.f32.mrb[131].mxu0 }
 0x34f   :  { %v3395_v50 = vadd.f32 %v3394_v44, %v3393_v56  ;;  %v2625_v57 = vadd.f32 %v3392_v60, %v4773_v1 }
 0x351   :  { %v2628_v52 = vadd.f32 %v3395_v50, %v4773_v1 }
 0x353   :  { %v3859_v24 = vpop.eup %3858  ;;  %v3396_v13 = vpop.f32.mrb[132].mxu0 }
 0x354   :  { %2916 = vst [vmem:[%s4910_s7 + $0x20] sm:$0xff] %v3859_v24  ;;  %v3397_v47 = vpop.f32.mrb[133].mxu0  ;;  %v3512_v7 = vpop.f32.mrb[216].mxu1 }
 0x355   :  { %v3861_v33 = vpop.eup %3860  ;;  %v3398_v9 = vadd.f32 %v3397_v47, %v3396_v13  ;;  %v3399_v30 = vpop.f32.mrb[134].mxu0 }
 0x356   :  { %v3863_v27 = vpop.eup %3862  ;;  %2917 = vst [vmem:[%s4910_s7 + $0x28] sm:$0xff] %v3861_v33  ;;  %v2785_v32 = vpop.f32.mrb[217].mxu1 }
 0x357   :  { %2918 = vst [vmem:[%s4910_s7 + $0x30] sm:$0xff] %v3863_v27  ;;  %v2786_v40 = vadd.f32 %v2785_v32, %v2625_v57  ;;  %v3400_v23 = vpop.f32.mrb[135].mxu0  ;;  %v3513_v48 = vpop.f32.mrb[218].mxu1  ;;  %v2633_v58 = vadd.f32 %v3398_v9, %v4773_v1 }
 0x358   :  { %v3865_v63 = vpop.eup %3864  ;;  %v3401_v28 = vadd.f32 %v3400_v23, %v3399_v30  ;;  %v2788_v22 = vpop.f32.mrb[219].mxu1 }
 0x359   :  { %2919 = vst [vmem:[%s4910_s7 + $0x38] sm:$0xff] %v3865_v63  ;;  %3866 = vtanh.f32 %v2786_v40  ;;  %v2789_v12 = vadd.f32 %v2788_v22, %v2628_v52  ;;  %v2794_v15 = vadd.f32 %v3512_v7, %v2633_v58 }
 0x35a   :  { %v2636_v61 = vadd.f32 %v3401_v28, %v4773_v1 }
 0x35b   :  { %3868 = vtanh.f32 %v2789_v12  ;;  %v3402_v18 = vpop.f32.mrb[136].mxu0 }
 0x35c   :  { %3870 = vtanh.f32 %v2794_v15  ;;  %v2797_v34 = vadd.f32 %v3513_v48, %v2636_v61  ;;  %v3403_v38 = vpop.f32.mrb[137].mxu0 }
 0x35d   :  { %v3404_v41 = vadd.f32 %v3403_v38, %v3402_v18  ;;  %v3405_v59 = vpop.f32.mrb[138].mxu0 }
 0x35e   :  { %3872 = vtanh.f32 %v2797_v34  ;;  %v3406_v20 = vpop.f32.mrb[139].mxu0 }
 0x35f   :  { %v3407_v6 = vadd.f32 %v3406_v20, %v3405_v59  ;;  %v2641_v37 = vadd.f32 %v3404_v41, %v4773_v1 }
 0x361   :  { %v2644_v16 = vadd.f32 %v3407_v6, %v4773_v1 }
 0x363   :  { %v3867_v4 = vpop.eup %3866  ;;  %v3408_v55 = vpop.f32.mrb[140].mxu0 }
 0x364   :  { %2920 = vst [vmem:[%s4910_s7 + $0x40] sm:$0xff] %v3867_v4  ;;  %v3409_v31 = vpop.f32.mrb[141].mxu0  ;;  %v3516_v17 = vpop.f32.mrb[220].mxu1 }
 0x365   :  { %v3869_v51 = vpop.eup %3868  ;;  %v3410_v2 = vadd.f32 %v3409_v31, %v3408_v55  ;;  %v3411_v29 = vpop.f32.mrb[142].mxu0 }
 0x366   :  { %v3871_v36 = vpop.eup %3870  ;;  %2921 = vst [vmem:[%s4910_s7 + $0x48] sm:$0xff] %v3869_v51  ;;  %v2801_v3 = vpop.f32.mrb[221].mxu1 }
 0x367   :  { %2922 = vst [vmem:[%s4910_s7 + $0x50] sm:$0xff] %v3871_v36  ;;  %v2802_v21 = vadd.f32 %v2801_v3, %v2641_v37  ;;  %v3412_v19 = vpop.f32.mrb[143].mxu0  ;;  %v3517_v46 = vpop.f32.mrb[222].mxu1  ;;  %v2649_v10 = vadd.f32 %v3410_v2, %v4773_v1 }
 0x368   :  { %v3873_v39 = vpop.eup %3872  ;;  %v3413_v43 = vadd.f32 %v3412_v19, %v3411_v29  ;;  %v2804_v25 = vpop.f32.mrb[223].mxu1 }
 0x369   :  { %2923 = vst [vmem:[%s4910_s7 + $0x58] sm:$0xff] %v3873_v39  ;;  %3874 = vtanh.f32 %v2802_v21  ;;  %v2805_v11 = vadd.f32 %v2804_v25, %v2644_v16  ;;  %v2810_v45 = vadd.f32 %v3516_v17, %v2649_v10 }
 0x36a   :  { %v2652_v8 = vadd.f32 %v3413_v43, %v4773_v1 }
 0x36b   :  { %3876 = vtanh.f32 %v2805_v11  ;;  %v3414_v42 = vpop.f32.mrb[144].mxu0 }
 0x36c   :  { %3878 = vtanh.f32 %v2810_v45  ;;  %v2813_v53 = vadd.f32 %v3517_v46, %v2652_v8  ;;  %v3415_v54 = vpop.f32.mrb[145].mxu0 }
 0x36d   :  { %v3416_v62 = vadd.f32 %v3415_v54, %v3414_v42  ;;  %v3417_v14 = vpop.f32.mrb[146].mxu0 }
 0x36e   :  { %3880 = vtanh.f32 %v2813_v53  ;;  %v3418_v49 = vpop.f32.mrb[147].mxu0 }
 0x36f   :  { %v3419_v5 = vadd.f32 %v3418_v49, %v3417_v14  ;;  %v2657_v44 = vadd.f32 %v3416_v62, %v4773_v1 }
 0x371   :  { %v2660_v27 = vadd.f32 %v3419_v5, %v4773_v1 }
 0x373   :  { %v3875_v35 = vpop.eup %3874  ;;  %v3420_v0 = vpop.f32.mrb[148].mxu0 }
 0x374   :  { %2924 = vst [vmem:[%s4910_s7 + $0x60] sm:$0xff] %v3875_v35  ;;  %v3421_v60 = vpop.f32.mrb[149].mxu0  ;;  %v3520_v56 = vpop.f32.mrb[224].mxu1 }
 0x375   :  { %v3877_v26 = vpop.eup %3876  ;;  %v3422_v24 = vadd.f32 %v3421_v60, %v3420_v0  ;;  %v3423_v13 = vpop.f32.mrb[150].mxu0 }
 0x376   :  { %v3879_v50 = vpop.eup %3878  ;;  %2925 = vst [vmem:[%s4910_s7 + $0x68] sm:$0xff] %v3877_v26  ;;  %v2817_v33 = vpop.f32.mrb[225].mxu1 }
 0x377   :  { %2926 = vst [vmem:[%s4910_s7 + $0x70] sm:$0xff] %v3879_v50  ;;  %v2818_v47 = vadd.f32 %v2817_v33, %v2657_v44  ;;  %v3424_v7 = vpop.f32.mrb[151].mxu0  ;;  %v3521_v57 = vpop.f32.mrb[226].mxu1  ;;  %v2665_v30 = vadd.f32 %v3422_v24, %v4773_v1 }
 0x378   :  { %v3881_v9 = vpop.eup %3880  ;;  %v3425_v32 = vadd.f32 %v3424_v7, %v3423_v13  ;;  %v2820_v40 = vpop.f32.mrb[227].mxu1 }
 0x379   :  { %2927 = vst [vmem:[%s4910_s7 + $0x78] sm:$0xff] %v3881_v9  ;;  %3882 = vtanh.f32 %v2818_v47  ;;  %v2821_v23 = vadd.f32 %v2820_v40, %v2660_v27  ;;  %v2826_v48 = vadd.f32 %v3520_v56, %v2665_v30 }
 0x37a   :  { %v2668_v52 = vadd.f32 %v3425_v32, %v4773_v1 }
 0x37b   :  { %3884 = vtanh.f32 %v2821_v23  ;;  %v3426_v58 = vpop.f32.mrb[152].mxu0 }
 0x37c   :  { %3886 = vtanh.f32 %v2826_v48  ;;  %v2829_v63 = vadd.f32 %v3521_v57, %v2668_v52  ;;  %v3427_v28 = vpop.f32.mrb[153].mxu0 }
 0x37d   :  { %v3428_v22 = vadd.f32 %v3427_v28, %v3426_v58  ;;  %v3429_v12 = vpop.f32.mrb[154].mxu0 }
 0x37e   :  { %3888 = vtanh.f32 %v2829_v63  ;;  %v3430_v15 = vpop.f32.mrb[155].mxu0 }
 0x37f   :  { %v3431_v61 = vadd.f32 %v3430_v15, %v3429_v12  ;;  %v2673_v20 = vadd.f32 %v3428_v22, %v4773_v1 }
 0x381   :  { %v2676_v36 = vadd.f32 %v3431_v61, %v4773_v1 }
 0x383   :  { %v3883_v34 = vpop.eup %3882  ;;  %v3432_v18 = vpop.f32.mrb[156].mxu0 }
 0x384   :  { %2928 = vst [vmem:[%s4910_s7 + $0x80] sm:$0xff] %v3883_v34  ;;  %v3433_v41 = vpop.f32.mrb[157].mxu0  ;;  %v3524_v59 = vpop.f32.mrb[228].mxu1 }
 0x385   :  { %v3885_v38 = vpop.eup %3884  ;;  %v3434_v4 = vadd.f32 %v3433_v41, %v3432_v18  ;;  %v3435_v55 = vpop.f32.mrb[158].mxu0 }
 0x386   :  { %v3887_v6 = vpop.eup %3886  ;;  %2929 = vst [vmem:[%s4910_s7 + $0x88] sm:$0xff] %v3885_v38  ;;  %v2833_v51 = vpop.f32.mrb[229].mxu1 }
 0x387   :  { %2930 = vst [vmem:[%s4910_s7 + $0x90] sm:$0xff] %v3887_v6  ;;  %v2834_v31 = vadd.f32 %v2833_v51, %v2673_v20  ;;  %v3436_v17 = vpop.f32.mrb[159].mxu0  ;;  %v3525_v37 = vpop.f32.mrb[230].mxu1  ;;  %v2681_v29 = vadd.f32 %v3434_v4, %v4773_v1 }
 0x388   :  { %v3889_v2 = vpop.eup %3888  ;;  %v3437_v3 = vadd.f32 %v3436_v17, %v3435_v55  ;;  %v2836_v21 = vpop.f32.mrb[231].mxu1 }
 0x389   :  { %2931 = vst [vmem:[%s4910_s7 + $0x98] sm:$0xff] %v3889_v2  ;;  %3890 = vtanh.f32 %v2834_v31  ;;  %v2837_v19 = vadd.f32 %v2836_v21, %v2676_v36  ;;  %v2842_v46 = vadd.f32 %v3524_v59, %v2681_v29 }
 0x38a   :  { %v2684_v16 = vadd.f32 %v3437_v3, %v4773_v1 }
 0x38b   :  { %3892 = vtanh.f32 %v2837_v19  ;;  %v3438_v10 = vpop.f32.mrb[160].mxu0 }
 0x38c   :  { %3894 = vtanh.f32 %v2842_v46  ;;  %v2845_v39 = vadd.f32 %v3525_v37, %v2684_v16  ;;  %v3439_v43 = vpop.f32.mrb[161].mxu0 }
 0x38d   :  { %v3440_v25 = vadd.f32 %v3439_v43, %v3438_v10  ;;  %v3441_v11 = vpop.f32.mrb[162].mxu0 }
 0x38e   :  { %3896 = vtanh.f32 %v2845_v39  ;;  %v3442_v45 = vpop.f32.mrb[163].mxu0 }
 0x38f   :  { %v3443_v8 = vadd.f32 %v3442_v45, %v3441_v11  ;;  %v2689_v49 = vadd.f32 %v3440_v25, %v4773_v1 }
 0x391   :  { %v2692_v50 = vadd.f32 %v3443_v8, %v4773_v1 }
 0x393   :  { %v3891_v53 = vpop.eup %3890  ;;  %v3444_v42 = vpop.f32.mrb[164].mxu0 }
 0x394   :  { %2932 = vst [vmem:[%s4910_s7 + $0xa0] sm:$0xff] %v3891_v53  ;;  %v3445_v62 = vpop.f32.mrb[165].mxu0  ;;  %v3528_v14 = vpop.f32.mrb[232].mxu1 }
 0x395   :  { %v3893_v54 = vpop.eup %3892  ;;  %v3446_v35 = vadd.f32 %v3445_v62, %v3444_v42  ;;  %v3447_v0 = vpop.f32.mrb[166].mxu0 }
 0x396   :  { %v3895_v5 = vpop.eup %3894  ;;  %2933 = vst [vmem:[%s4910_s7 + $0xa8] sm:$0xff] %v3893_v54  ;;  %v2849_v26 = vpop.f32.mrb[233].mxu1 }
 0x397   :  { %2934 = vst [vmem:[%s4910_s7 + $0xb0] sm:$0xff] %v3895_v5  ;;  %v2850_v60 = vadd.f32 %v2849_v26, %v2689_v49  ;;  %v3448_v56 = vpop.f32.mrb[167].mxu0  ;;  %v3529_v44 = vpop.f32.mrb[234].mxu1  ;;  %v2697_v13 = vadd.f32 %v3446_v35, %v4773_v1 }
 0x398   :  { %v3897_v24 = vpop.eup %3896  ;;  %v3449_v33 = vadd.f32 %v3448_v56, %v3447_v0  ;;  %v2852_v47 = vpop.f32.mrb[235].mxu1 }
 0x399   :  { %2935 = vst [vmem:[%s4910_s7 + $0xb8] sm:$0xff] %v3897_v24  ;;  %3898 = vtanh.f32 %v2850_v60  ;;  %v2853_v7 = vadd.f32 %v2852_v47, %v2692_v50  ;;  %v2858_v57 = vadd.f32 %v3528_v14, %v2697_v13 }
 0x39a   :  { %v2700_v27 = vadd.f32 %v3449_v33, %v4773_v1 }
 0x39b   :  { %3900 = vtanh.f32 %v2853_v7  ;;  %v3450_v30 = vpop.f32.mrb[168].mxu0 }
 0x39c   :  { %3902 = vtanh.f32 %v2858_v57  ;;  %v2861_v9 = vadd.f32 %v3529_v44, %v2700_v27  ;;  %v3451_v32 = vpop.f32.mrb[169].mxu0 }
 0x39d   :  { %v3452_v40 = vadd.f32 %v3451_v32, %v3450_v30  ;;  %v3453_v23 = vpop.f32.mrb[170].mxu0 }
 0x39e   :  { %3904 = vtanh.f32 %v2861_v9  ;;  %v3454_v48 = vpop.f32.mrb[171].mxu0 }
 0x39f   :  { %v3455_v52 = vadd.f32 %v3454_v48, %v3453_v23  ;;  %v2705_v15 = vadd.f32 %v3452_v40, %v4773_v1 }
 0x3a1   :  { %v2708_v6 = vadd.f32 %v3455_v52, %v4773_v1 }
 0x3a3   :  { %v3899_v63 = vpop.eup %3898  ;;  %v3456_v58 = vpop.f32.mrb[172].mxu0 }
 0x3a4   :  { %2936 = vst [vmem:[%s4910_s7 + $0xc0] sm:$0xff] %v3899_v63  ;;  %v3457_v22 = vpop.f32.mrb[173].mxu0  ;;  %v3532_v12 = vpop.f32.mrb[236].mxu1 }
 0x3a5   :  { %v3901_v28 = vpop.eup %3900  ;;  %v3458_v34 = vadd.f32 %v3457_v22, %v3456_v58  ;;  %v3459_v18 = vpop.f32.mrb[174].mxu0 }
 0x3a6   :  { %v3903_v61 = vpop.eup %3902  ;;  %2937 = vst [vmem:[%s4910_s7 + $0xc8] sm:$0xff] %v3901_v28  ;;  %v2865_v38 = vpop.f32.mrb[237].mxu1 }
 0x3a7   :  { %2938 = vst [vmem:[%s4910_s7 + $0xd0] sm:$0xff] %v3903_v61  ;;  %v2866_v41 = vadd.f32 %v2865_v38, %v2705_v15  ;;  %v3460_v59 = vpop.f32.mrb[175].mxu0  ;;  %v3533_v20 = vpop.f32.mrb[238].mxu1  ;;  %v2713_v55 = vadd.f32 %v3458_v34, %v4773_v1 }
 0x3a8   :  { %v3905_v4 = vpop.eup %3904  ;;  %v3461_v51 = vadd.f32 %v3460_v59, %v3459_v18  ;;  %v2868_v31 = vpop.f32.mrb[239].mxu1 }
 0x3a9   :  { %2939 = vst [vmem:[%s4910_s7 + $0xd8] sm:$0xff] %v3905_v4  ;;  %3906 = vtanh.f32 %v2866_v41  ;;  %v2869_v17 = vadd.f32 %v2868_v31, %v2708_v6  ;;  %v2874_v37 = vadd.f32 %v3532_v12, %v2713_v55 }
 0x3aa   :  { %v2716_v36 = vadd.f32 %v3461_v51, %v4773_v1 }
 0x3ab   :  { %3908 = vtanh.f32 %v2869_v17 }
 0x3ac   :  { %3910 = vtanh.f32 %v2874_v37  ;;  %v2877_v2 = vadd.f32 %v3533_v20, %v2716_v36 }
 0x3ae   :  { %3912 = vtanh.f32 %v2877_v2 }
 0x3b3   :  { %v3907_v29 = vpop.eup %3906 }
 0x3b4   :  { %2940 = vst [vmem:[%s4910_s7 + $0xe0] sm:$0xff] %v3907_v29 }
 0x3b5   :  { %v3909_v3 = vpop.eup %3908 }
 0x3b6   :  { %v3911_v21 = vpop.eup %3910  ;;  %2941 = vst [vmem:[%s4910_s7 + $0xe8] sm:$0xff] %v3909_v3 }
 0x3b7   :  { %2942 = vst [vmem:[%s4910_s7 + $0xf0] sm:$0xff] %v3911_v21 }
 0x3b8   :  { %v3913_v1 = vpop.eup %3912 }
 0x3b9   :  { %2943 = vst [vmem:[%s4910_s7 + $0xf8] sm:$0xff] %v3913_v1 }
 0x3ba   :  { %2948 = vsyncpa [#allocation3], 1 }

</bundles_post_ra>
